<compile_context>
chip_gen: v5e
topology: v5e:2x2
jax: 0.10.0
libtpu: 0.0.40
codegen_flags: <defaults>
</compile_context>

<pallas_src>
import jax
import jax.numpy as jnp
import numpy as np
from jax import lax
from jax.experimental import pallas as pl
from jax.experimental.pallas import tpu as pltpu


def _lstm_disc_kernel(x_ref, wio_ref, wrec_ref, out_ref):
    """Two-layer LSTM recurrence + FC head, everything VMEM/register resident.

    Packed layouts (prepared once in `prepare_params`):
      wio_ref : rows [0:in)            = wih0   (in, 4H)   (gate order i,f,o,g;
                rows [in_pad:in_pad+4) = [b0; b1; fc_w_row; fc_b_row]
      wrec_ref: rows [0:H)   = whh0 (H, 4H)
                rows [H:3H)  = [wih1; whh1] fused (2H, 4H)
      g-gate columns of all gate weights/biases are pre-scaled by 2 so a single
      sigmoid over (1, 4H) yields i, f, o directly and g = 2*s_g - 1.
    """
    seq, in_dim = x_ref.shape
    H = wrec_ref.shape[0] // 3
    in_pad = wio_ref.shape[0] - 4          # misc slab = last 4 rows

    # Whole-array loads; total footprint is a few KB.
    x = x_ref[...]                                         # (seq, in)
    wih0 = wio_ref[0:in_dim, :]                            # (in, 4H)
    misc = wio_ref[in_pad:in_pad + 4, :]                   # (4, 4H)
    b0 = misc[0:1, :]                                      # (1, 4H)
    b1 = misc[1:2, :]                                      # (1, 4H)
    whh0 = wrec_ref[0:H, :]                                # (H, 4H)
    w1 = wrec_ref[H:3 * H, :]                              # (2H, 4H)

    # Hoisted, sequence-parallel layer-0 input projection (no recurrent dep):
    # one (seq, in) x (in, 4H) MXU matmul, kept in registers (one f32 vreg).
    # NOTE: default MXU matmul precision (same as the pure-JAX reference).
    g1pre = jnp.dot(x, wih0, preferred_element_type=jnp.float32) + b0   # (seq, 4H)

    def cell(pre, c):
        # One sigmoid over the full gate vector (i, f, o, g*2-prescaled),
        # one tanh for the cell output: 2 EUP ops per layer-step.
        s = jax.nn.sigmoid(pre)
        i = s[:, 0:H]
        f = s[:, H:2 * H]
        o = s[:, 2 * H:3 * H]
        g = 2.0 * s[:, 3 * H:4 * H] - 1.0      # tanh(z) = 2*sigmoid(2z) - 1
        c_new = f * c + i * g
        h_new = o * jnp.tanh(c_new)
        return h_new, c_new

    zeros = jnp.zeros((1, H), jnp.float32)
    h1, c1, h2, c2 = zeros, zeros, zeros, zeros

    # Fully unrolled recurrence; seq is small and static, so row indices into
    # g1pre are static and the scheduler sees the whole dependence chain.
    for t in range(seq):
        # ----- layer 0: input projection precomputed; one recurrent matmul.
        pre1 = g1pre[t:t + 1, :] + jnp.dot(h1, whh0,
                                           preferred_element_type=jnp.float32)
        h1, c1 = cell(pre1, c1)
        # ----- layer 1: single fused matmul over the concatenated hidden state.
        hcat = jnp.concatenate([h1, h2], axis=1)            # (1, 2H)
        pre2 = jnp.dot(hcat, w1, preferred_element_type=jnp.float32) + b1
        h2, c2 = cell(pre2, c2)

    # FC head on VPU + XLU (no N=1 MXU matmul): multiply against the fc weight
    # row, lane-reduce, add bias, sigmoid.
    fcw = misc[2:3, 0:H]                                    # (1, H)
    fcb = misc[3:4, 0:1]                                    # (1, 1)
    logit = jnp.sum(h2 * fcw, axis=-1, keepdims=True) + fcb
    out_ref[...] = jax.nn.sigmoid(logit)


def init_params(key, obs_dim, act_dim, hidden_dim):
    """Deterministic parameter init mirroring nn.LSTM / nn.Linear shapes."""
    input_dim = 2 * obs_dim + act_dim
    k = 1.0 / np.sqrt(hidden_dim)
    keys = jax.random.split(key, 11)

    def u(kk, shape):
        return jax.random.uniform(kk, shape, jnp.float32, minval=-k, maxval=k)

    return {
        # PyTorch layouts: weight_ih_l0 (4H, in), weight_hh_l0 (4H, H), biases (4H,)
        "w_ih_l0": u(keys[0], (4 * hidden_dim, input_dim)),
        "w_hh_l0": u(keys[1], (4 * hidden_dim, hidden_dim)),
        "b_ih_l0": u(keys[2], (4 * hidden_dim,)),
        "b_hh_l0": u(keys[3], (4 * hidden_dim,)),
        "w_ih_l1": u(keys[4], (4 * hidden_dim, hidden_dim)),
        "w_hh_l1": u(keys[5], (4 * hidden_dim, hidden_dim)),
        "b_ih_l1": u(keys[6], (4 * hidden_dim,)),
        "b_hh_l1": u(keys[7], (4 * hidden_dim,)),
        # nn.Linear(hidden_dim, 1): weight (1, H), bias (1,)
        "fc_w": u(keys[8], (1, hidden_dim)),
        "fc_b": u(keys[9], (1,)),
    }


def _reorder_gates(a):
    """Permute PyTorch gate packing (i, f, g, o) -> (i, f, o, g) along axis 0."""
    i, f, g, o = jnp.split(a, 4, axis=0)
    return jnp.concatenate([i, f, o, g], axis=0)


def prepare_params(params):
    """One-time weight prep.

    Transpose, permute gates to (i, f, o, g), fold ih+hh biases, pre-scale the
    g-gate columns by 2 (tanh-via-sigmoid identity), fuse layer-1's ih/hh
    weights, and pack everything into two VMEM slabs so the kernel prologue is
    3 DMAs (x + 2 slabs) instead of 9.
    """
    H = params["w_hh_l0"].shape[1]
    in_dim = params["w_ih_l0"].shape[1]
    in_pad = -(-in_dim // 8) * 8                      # sublane-align misc slab

    # g-gate columns (last H lanes after the (i,f,o,g) reorder) scaled by 2.
    # The x2 is a power of two -> exact in f32/bf16, numerically free.
    scale = jnp.concatenate([jnp.ones((3 * H,), jnp.float32),
                             jnp.full((H,), 2.0, jnp.float32)])       # (4H,)

    def prep_w(w):        # PyTorch (4H, K) -> (K, 4H), reordered, g-scaled
        return _reorder_gates(w).T * scale[None, :]

    def prep_b(b_ih, b_hh):
        return (_reorder_gates(b_ih + b_hh) * scale)[None, :]         # (1, 4H)

    wih0 = prep_w(params["w_ih_l0"])                                  # (in, 4H)
    whh0 = prep_w(params["w_hh_l0"])                                  # (H, 4H)
    w1 = jnp.concatenate([prep_w(params["w_ih_l1"]),
                          prep_w(params["w_hh_l1"])], axis=0)         # (2H, 4H)
    b0 = prep_b(params["b_ih_l0"], params["b_hh_l0"])
    b1 = prep_b(params["b_ih_l1"], params["b_hh_l1"])

    fcw = jnp.zeros((1, 4 * H), jnp.float32).at[0, 0:H].set(params["fc_w"][0])
    fcb = jnp.zeros((1, 4 * H), jnp.float32).at[0, 0].set(params["fc_b"][0])

    w_io = jnp.zeros((in_pad + 4, 4 * H), jnp.float32)
    w_io = w_io.at[0:in_dim, :].set(wih0)
    w_io = w_io.at[in_pad:in_pad + 4, :].set(
        jnp.concatenate([b0, b1, fcw, fcb], axis=0))
    w_rec = jnp.concatenate([whh0, w1], axis=0)                       # (3H, 4H)

    return {"w_io": jnp.asarray(w_io, jnp.float32),
            "w_rec": jnp.asarray(w_rec, jnp.float32)}


@jax.jit
def lstm_discriminator_forward(x, prepped):
    """x: (seq_len, 2*obs_dim + act_dim) float32 -> (1, 1) probability."""
    seq, in_dim = x.shape
    H = prepped["w_rec"].shape[0] // 3

    # Advisory cost hint so XLA does not over-schedule around this tiny call.
    flops = (2 * seq * in_dim * 4 * H          # hoisted layer-0 input projection
             + seq * (2 * H * 4 * H            # layer-0 recurrent matmul / step
                      + 2 * 2 * H * 4 * H)     # fused layer-1 matmul / step
             + 2 * H)                          # FC head
    transcendentals = seq * 2 * 5 * H + 1      # sigmoid(4H)+tanh(H) per layer-step
    bytes_accessed = 4 * (int(np.prod(x.shape))
                          + int(np.prod(prepped["w_io"].shape))
                          + int(np.prod(prepped["w_rec"].shape)) + 1)

    vmem = pl.BlockSpec(memory_space=pltpu.MemorySpace.VMEM)
    return pl.pallas_call(
        _lstm_disc_kernel,
        out_shape=jax.ShapeDtypeStruct((1, 1), jnp.float32),
        in_specs=[vmem, vmem, vmem],
        out_specs=vmem,
        cost_estimate=pl.CostEstimate(flops=flops,
                                      transcendentals=transcendentals,
                                      bytes_accessed=bytes_accessed),
    )(x, prepped["w_io"], prepped["w_rec"])


def reference_forward(x, params):
    """Pure-JAX reference of the same forward pass (for correctness check)."""
    H = params["w_hh_l0"].shape[1]

    def cell(h, c, gates):
        i = jax.nn.sigmoid(gates[:, 0:H])
        f = jax.nn.sigmoid(gates[:, H:2 * H])
        g = jnp.tanh(gates[:, 2 * H:3 * H])
        o = jax.nn.sigmoid(gates[:, 3 * H:4 * H])
        c = f * c + i * g
        h = o * jnp.tanh(c)
        return h, c

    def scan_body(carry, x_t):
        h1, c1, h2, c2 = carry
        g1 = (x_t[None, :] @ params["w_ih_l0"].T + h1 @ params["w_hh_l0"].T
              + params["b_ih_l0"] + params["b_hh_l0"])
        h1, c1 = cell(h1, c1, g1)
        g2 = (h1 @ params["w_ih_l1"].T + h2 @ params["w_hh_l1"].T
              + params["b_ih_l1"] + params["b_hh_l1"])
        h2, c2 = cell(h2, c2, g2)
        return (h1, c1, h2, c2), None

    zeros = jnp.zeros((1, H), jnp.float32)
    (h1, c1, h2, c2), _ = lax.scan(scan_body, (zeros, zeros, zeros, zeros), x)
    # Full-precision FC head: the kernel computes this head in exact f32 on the
    # VPU, so avoid default-precision MXU rounding on the reference's head
    # (recurrence matmuls above keep the default, matching the kernel).
    logit = jnp.dot(h2, params["fc_w"].T,
                    precision=lax.Precision.HIGHEST) + params["fc_b"]
    return jax.nn.sigmoid(logit)


if __name__ == "__main__":
    obs_dim, act_dim, hidden_dim, seq_len = 4, 2, 32, 8
    input_dim = 2 * obs_dim + act_dim  # 10

    key = jax.random.PRNGKey(0)
    pkey, xkey = jax.random.split(key)
    params = init_params(pkey, obs_dim, act_dim, hidden_dim)
    prepped = prepare_params(params)          # one-time weight prep (not per call)
    x = jax.random.normal(xkey, (seq_len, input_dim), jnp.float32)

    out = jax.block_until_ready(lstm_discriminator_forward(x, prepped))
    ref = jax.block_until_ready(reference_forward(x, params))

    # 1e-5-class check; small atol margin for the tanh(x)=2*sigmoid(2x)-1
    # identity used in the kernel (perturbs results at the ~1e-6 level).
    np.testing.assert_allclose(np.asarray(out), np.asarray(ref),
                               rtol=1e-5, atol=2e-5)
    assert out.shape == (1, 1)

    print("KERNEL_OK")
</pallas_src>

<mosaic_0001>
module attributes {stable_mosaic.version = 11 : i64} {
  func.func @_lstm_disc_kernel(%arg0: memref<8x10xf32, #tpu.memory_space<vmem>>, %arg1: memref<20x128xf32, #tpu.memory_space<vmem>>, %arg2: memref<96x128xf32, #tpu.memory_space<vmem>>, %arg3: memref<1x1xf32, #tpu.memory_space<vmem>>) attributes {dimension_semantics = [], scalar_prefetch = 0 : i64, scratch_operands = 0 : i64, tpu.core_type = #tpu.core_type<tc>} {
    %c0 = arith.constant 0 : index
    %c0_0 = arith.constant 0 : index
    %0 = vector.load %arg0[%c0, %c0_0] : memref<8x10xf32, #tpu.memory_space<vmem>>, vector<8x10xf32>
    %c0_1 = arith.constant 0 : index
    %c0_2 = arith.constant 0 : index
    %1 = vector.load %arg1[%c0_1, %c0_2] : memref<20x128xf32, #tpu.memory_space<vmem>>, vector<10x128xf32>
    %c16 = arith.constant 16 : index
    %c0_3 = arith.constant 0 : index
    %2 = vector.load %arg1[%c16, %c0_3] : memref<20x128xf32, #tpu.memory_space<vmem>>, vector<4x128xf32>
    %3 = vector.extract_strided_slice %2 {offsets = [0, 0], sizes = [1, 128], strides = [1, 1]} : vector<4x128xf32> to vector<1x128xf32>
    %4 = vector.extract_strided_slice %2 {offsets = [1, 0], sizes = [1, 128], strides = [1, 1]} : vector<4x128xf32> to vector<1x128xf32>
    %c0_4 = arith.constant 0 : index
    %c0_5 = arith.constant 0 : index
    %5 = vector.load %arg2[%c0_4, %c0_5] : memref<96x128xf32, #tpu.memory_space<vmem>>, vector<32x128xf32>
    %c32 = arith.constant 32 : index
    %c0_6 = arith.constant 0 : index
    %6 = vector.load %arg2[%c32, %c0_6] : memref<96x128xf32, #tpu.memory_space<vmem>>, vector<64x128xf32>
    %cst = arith.constant dense<0.000000e+00> : vector<8x128xf32>
    %7 = tpu.matmul %0, %1, %cst {dimension_numbers = #tpu.dot_dimension_numbers<[1], [0], [0], [1], [0, 0, 1, 1], [], []>} : vector<8x10xf32>, vector<10x128xf32>, vector<8x128xf32> -> vector<8x128xf32>
    %8 = vector.broadcast %3 : vector<1x128xf32> to vector<8x128xf32>
    %9 = arith.addf %7, %8 : vector<8x128xf32>
    %cst_7 = arith.constant 0.000000e+00 : f32
    %10 = vector.broadcast %cst_7 : f32 to vector<1x32xf32>
    %11 = vector.extract_strided_slice %9 {offsets = [0, 0], sizes = [1, 128], strides = [1, 1]} : vector<8x128xf32> to vector<1x128xf32>
    %cst_8 = arith.constant dense<0.000000e+00> : vector<1x128xf32>
    %12 = tpu.matmul %10, %5, %cst_8 {dimension_numbers = #tpu.dot_dimension_numbers<[1], [0], [0], [1], [0, 0, 1, 1], [], []>} : vector<1x32xf32>, vector<32x128xf32>, vector<1x128xf32> -> vector<1x128xf32>
    %13 = arith.addf %11, %12 : vector<1x128xf32>
    %14 = arith.negf %13 : vector<1x128xf32>
    %15 = math.exp %14 : vector<1x128xf32>
    %cst_9 = arith.constant 1.000000e+00 : f32
    %16 = vector.broadcast %cst_9 : f32 to vector<1x128xf32>
    %17 = arith.addf %16, %15 : vector<1x128xf32>
    %18 = arith.divf %16, %17 : vector<1x128xf32>
    %19 = vector.extract_strided_slice %18 {offsets = [0, 0], sizes = [1, 32], strides = [1, 1]} : vector<1x128xf32> to vector<1x32xf32>
    %20 = vector.extract_strided_slice %18 {offsets = [0, 32], sizes = [1, 32], strides = [1, 1]} : vector<1x128xf32> to vector<1x32xf32>
    %21 = vector.extract_strided_slice %18 {offsets = [0, 64], sizes = [1, 32], strides = [1, 1]} : vector<1x128xf32> to vector<1x32xf32>
    %22 = vector.extract_strided_slice %18 {offsets = [0, 96], sizes = [1, 32], strides = [1, 1]} : vector<1x128xf32> to vector<1x32xf32>
    %cst_10 = arith.constant 2.000000e+00 : f32
    %23 = vector.broadcast %cst_10 : f32 to vector<1x32xf32>
    %24 = arith.mulf %23, %22 : vector<1x32xf32>
    %cst_11 = arith.constant 1.000000e+00 : f32
    %25 = vector.broadcast %cst_11 : f32 to vector<1x32xf32>
    %26 = arith.subf %24, %25 : vector<1x32xf32>
    %27 = arith.mulf %20, %10 : vector<1x32xf32>
    %28 = arith.mulf %19, %26 : vector<1x32xf32>
    %29 = arith.addf %27, %28 : vector<1x32xf32>
    %30 = math.tanh %29 : vector<1x32xf32>
    %31 = arith.mulf %21, %30 : vector<1x32xf32>
    %32 = tpu.concatenate %31, %10 in 1 : vector<1x32xf32>, vector<1x32xf32> -> vector<1x64xf32>
    %cst_12 = arith.constant dense<0.000000e+00> : vector<1x128xf32>
    %33 = tpu.matmul %32, %6, %cst_12 {dimension_numbers = #tpu.dot_dimension_numbers<[1], [0], [0], [1], [0, 0, 1, 1], [], []>} : vector<1x64xf32>, vector<64x128xf32>, vector<1x128xf32> -> vector<1x128xf32>
    %34 = arith.addf %33, %4 : vector<1x128xf32>
    %35 = arith.negf %34 : vector<1x128xf32>
    %36 = math.exp %35 : vector<1x128xf32>
    %cst_13 = arith.constant 1.000000e+00 : f32
    %37 = vector.broadcast %cst_13 : f32 to vector<1x128xf32>
    %38 = arith.addf %37, %36 : vector<1x128xf32>
    %39 = arith.divf %37, %38 : vector<1x128xf32>
    %40 = vector.extract_strided_slice %39 {offsets = [0, 0], sizes = [1, 32], strides = [1, 1]} : vector<1x128xf32> to vector<1x32xf32>
    %41 = vector.extract_strided_slice %39 {offsets = [0, 32], sizes = [1, 32], strides = [1, 1]} : vector<1x128xf32> to vector<1x32xf32>
    %42 = vector.extract_strided_slice %39 {offsets = [0, 64], sizes = [1, 32], strides = [1, 1]} : vector<1x128xf32> to vector<1x32xf32>
    %43 = vector.extract_strided_slice %39 {offsets = [0, 96], sizes = [1, 32], strides = [1, 1]} : vector<1x128xf32> to vector<1x32xf32>
    %cst_14 = arith.constant 2.000000e+00 : f32
    %44 = vector.broadcast %cst_14 : f32 to vector<1x32xf32>
    %45 = arith.mulf %44, %43 : vector<1x32xf32>
    %cst_15 = arith.constant 1.000000e+00 : f32
    %46 = vector.broadcast %cst_15 : f32 to vector<1x32xf32>
    %47 = arith.subf %45, %46 : vector<1x32xf32>
    %48 = arith.mulf %41, %10 : vector<1x32xf32>
    %49 = arith.mulf %40, %47 : vector<1x32xf32>
    %50 = arith.addf %48, %49 : vector<1x32xf32>
    %51 = math.tanh %50 : vector<1x32xf32>
    %52 = arith.mulf %42, %51 : vector<1x32xf32>
    %53 = vector.extract_strided_slice %9 {offsets = [1, 0], sizes = [1, 128], strides = [1, 1]} : vector<8x128xf32> to vector<1x128xf32>
    %cst_16 = arith.constant dense<0.000000e+00> : vector<1x128xf32>
    %54 = tpu.matmul %31, %5, %cst_16 {dimension_numbers = #tpu.dot_dimension_numbers<[1], [0], [0], [1], [0, 0, 1, 1], [], []>} : vector<1x32xf32>, vector<32x128xf32>, vector<1x128xf32> -> vector<1x128xf32>
    %55 = arith.addf %53, %54 : vector<1x128xf32>
    %56 = arith.negf %55 : vector<1x128xf32>
    %57 = math.exp %56 : vector<1x128xf32>
    %cst_17 = arith.constant 1.000000e+00 : f32
    %58 = vector.broadcast %cst_17 : f32 to vector<1x128xf32>
    %59 = arith.addf %58, %57 : vector<1x128xf32>
    %60 = arith.divf %58, %59 : vector<1x128xf32>
    %61 = vector.extract_strided_slice %60 {offsets = [0, 0], sizes = [1, 32], strides = [1, 1]} : vector<1x128xf32> to vector<1x32xf32>
    %62 = vector.extract_strided_slice %60 {offsets = [0, 32], sizes = [1, 32], strides = [1, 1]} : vector<1x128xf32> to vector<1x32xf32>
    %63 = vector.extract_strided_slice %60 {offsets = [0, 64], sizes = [1, 32], strides = [1, 1]} : vector<1x128xf32> to vector<1x32xf32>
    %64 = vector.extract_strided_slice %60 {offsets = [0, 96], sizes = [1, 32], strides = [1, 1]} : vector<1x128xf32> to vector<1x32xf32>
    %cst_18 = arith.constant 2.000000e+00 : f32
    %65 = vector.broadcast %cst_18 : f32 to vector<1x32xf32>
    %66 = arith.mulf %65, %64 : vector<1x32xf32>
    %cst_19 = arith.constant 1.000000e+00 : f32
    %67 = vector.broadcast %cst_19 : f32 to vector<1x32xf32>
    %68 = arith.subf %66, %67 : vector<1x32xf32>
    %69 = arith.mulf %62, %29 : vector<1x32xf32>
    %70 = arith.mulf %61, %68 : vector<1x32xf32>
    %71 = arith.addf %69, %70 : vector<1x32xf32>
    %72 = math.tanh %71 : vector<1x32xf32>
    %73 = arith.mulf %63, %72 : vector<1x32xf32>
    %74 = tpu.concatenate %73, %52 in 1 : vector<1x32xf32>, vector<1x32xf32> -> vector<1x64xf32>
    %cst_20 = arith.constant dense<0.000000e+00> : vector<1x128xf32>
    %75 = tpu.matmul %74, %6, %cst_20 {dimension_numbers = #tpu.dot_dimension_numbers<[1], [0], [0], [1], [0, 0, 1, 1], [], []>} : vector<1x64xf32>, vector<64x128xf32>, vector<1x128xf32> -> vector<1x128xf32>
    %76 = arith.addf %75, %4 : vector<1x128xf32>
    %77 = arith.negf %76 : vector<1x128xf32>
    %78 = math.exp %77 : vector<1x128xf32>
    %cst_21 = arith.constant 1.000000e+00 : f32
    %79 = vector.broadcast %cst_21 : f32 to vector<1x128xf32>
    %80 = arith.addf %79, %78 : vector<1x128xf32>
    %81 = arith.divf %79, %80 : vector<1x128xf32>
    %82 = vector.extract_strided_slice %81 {offsets = [0, 0], sizes = [1, 32], strides = [1, 1]} : vector<1x128xf32> to vector<1x32xf32>
    %83 = vector.extract_strided_slice %81 {offsets = [0, 32], sizes = [1, 32], strides = [1, 1]} : vector<1x128xf32> to vector<1x32xf32>
    %84 = vector.extract_strided_slice %81 {offsets = [0, 64], sizes = [1, 32], strides = [1, 1]} : vector<1x128xf32> to vector<1x32xf32>
    %85 = vector.extract_strided_slice %81 {offsets = [0, 96], sizes = [1, 32], strides = [1, 1]} : vector<1x128xf32> to vector<1x32xf32>
    %cst_22 = arith.constant 2.000000e+00 : f32
    %86 = vector.broadcast %cst_22 : f32 to vector<1x32xf32>
    %87 = arith.mulf %86, %85 : vector<1x32xf32>
    %cst_23 = arith.constant 1.000000e+00 : f32
    %88 = vector.broadcast %cst_23 : f32 to vector<1x32xf32>
    %89 = arith.subf %87, %88 : vector<1x32xf32>
    %90 = arith.mulf %83, %50 : vector<1x32xf32>
    %91 = arith.mulf %82, %89 : vector<1x32xf32>
    %92 = arith.addf %90, %91 : vector<1x32xf32>
    %93 = math.tanh %92 : vector<1x32xf32>
    %94 = arith.mulf %84, %93 : vector<1x32xf32>
    %95 = vector.extract_strided_slice %9 {offsets = [2, 0], sizes = [1, 128], strides = [1, 1]} : vector<8x128xf32> to vector<1x128xf32>
    %cst_24 = arith.constant dense<0.000000e+00> : vector<1x128xf32>
    %96 = tpu.matmul %73, %5, %cst_24 {dimension_numbers = #tpu.dot_dimension_numbers<[1], [0], [0], [1], [0, 0, 1, 1], [], []>} : vector<1x32xf32>, vector<32x128xf32>, vector<1x128xf32> -> vector<1x128xf32>
    %97 = arith.addf %95, %96 : vector<1x128xf32>
    %98 = arith.negf %97 : vector<1x128xf32>
    %99 = math.exp %98 : vector<1x128xf32>
    %cst_25 = arith.constant 1.000000e+00 : f32
    %100 = vector.broadcast %cst_25 : f32 to vector<1x128xf32>
    %101 = arith.addf %100, %99 : vector<1x128xf32>
    %102 = arith.divf %100, %101 : vector<1x128xf32>
    %103 = vector.extract_strided_slice %102 {offsets = [0, 0], sizes = [1, 32], strides = [1, 1]} : vector<1x128xf32> to vector<1x32xf32>
    %104 = vector.extract_strided_slice %102 {offsets = [0, 32], sizes = [1, 32], strides = [1, 1]} : vector<1x128xf32> to vector<1x32xf32>
    %105 = vector.extract_strided_slice %102 {offsets = [0, 64], sizes = [1, 32], strides = [1, 1]} : vector<1x128xf32> to vector<1x32xf32>
    %106 = vector.extract_strided_slice %102 {offsets = [0, 96], sizes = [1, 32], strides = [1, 1]} : vector<1x128xf32> to vector<1x32xf32>
    %cst_26 = arith.constant 2.000000e+00 : f32
    %107 = vector.broadcast %cst_26 : f32 to vector<1x32xf32>
    %108 = arith.mulf %107, %106 : vector<1x32xf32>
    %cst_27 = arith.constant 1.000000e+00 : f32
    %109 = vector.broadcast %cst_27 : f32 to vector<1x32xf32>
    %110 = arith.subf %108, %109 : vector<1x32xf32>
    %111 = arith.mulf %104, %71 : vector<1x32xf32>
    %112 = arith.mulf %103, %110 : vector<1x32xf32>
    %113 = arith.addf %111, %112 : vector<1x32xf32>
    %114 = math.tanh %113 : vector<1x32xf32>
    %115 = arith.mulf %105, %114 : vector<1x32xf32>
    %116 = tpu.concatenate %115, %94 in 1 : vector<1x32xf32>, vector<1x32xf32> -> vector<1x64xf32>
    %cst_28 = arith.constant dense<0.000000e+00> : vector<1x128xf32>
    %117 = tpu.matmul %116, %6, %cst_28 {dimension_numbers = #tpu.dot_dimension_numbers<[1], [0], [0], [1], [0, 0, 1, 1], [], []>} : vector<1x64xf32>, vector<64x128xf32>, vector<1x128xf32> -> vector<1x128xf32>
    %118 = arith.addf %117, %4 : vector<1x128xf32>
    %119 = arith.negf %118 : vector<1x128xf32>
    %120 = math.exp %119 : vector<1x128xf32>
    %cst_29 = arith.constant 1.000000e+00 : f32
    %121 = vector.broadcast %cst_29 : f32 to vector<1x128xf32>
    %122 = arith.addf %121, %120 : vector<1x128xf32>
    %123 = arith.divf %121, %122 : vector<1x128xf32>
    %124 = vector.extract_strided_slice %123 {offsets = [0, 0], sizes = [1, 32], strides = [1, 1]} : vector<1x128xf32> to vector<1x32xf32>
    %125 = vector.extract_strided_slice %123 {offsets = [0, 32], sizes = [1, 32], strides = [1, 1]} : vector<1x128xf32> to vector<1x32xf32>
    %126 = vector.extract_strided_slice %123 {offsets = [0, 64], sizes = [1, 32], strides = [1, 1]} : vector<1x128xf32> to vector<1x32xf32>
    %127 = vector.extract_strided_slice %123 {offsets = [0, 96], sizes = [1, 32], strides = [1, 1]} : vector<1x128xf32> to vector<1x32xf32>
    %cst_30 = arith.constant 2.000000e+00 : f32
    %128 = vector.broadcast %cst_30 : f32 to vector<1x32xf32>
    %129 = arith.mulf %128, %127 : vector<1x32xf32>
    %cst_31 = arith.constant 1.000000e+00 : f32
    %130 = vector.broadcast %cst_31 : f32 to vector<1x32xf32>
    %131 = arith.subf %129, %130 : vector<1x32xf32>
    %132 = arith.mulf %125, %92 : vector<1x32xf32>
    %133 = arith.mulf %124, %131 : vector<1x32xf32>
    %134 = arith.addf %132, %133 : vector<1x32xf32>
    %135 = math.tanh %134 : vector<1x32xf32>
    %136 = arith.mulf %126, %135 : vector<1x32xf32>
    %137 = vector.extract_strided_slice %9 {offsets = [3, 0], sizes = [1, 128], strides = [1, 1]} : vector<8x128xf32> to vector<1x128xf32>
    %cst_32 = arith.constant dense<0.000000e+00> : vector<1x128xf32>
    %138 = tpu.matmul %115, %5, %cst_32 {dimension_numbers = #tpu.dot_dimension_numbers<[1], [0], [0], [1], [0, 0, 1, 1], [], []>} : vector<1x32xf32>, vector<32x128xf32>, vector<1x128xf32> -> vector<1x128xf32>
    %139 = arith.addf %137, %138 : vector<1x128xf32>
    %140 = arith.negf %139 : vector<1x128xf32>
    %141 = math.exp %140 : vector<1x128xf32>
    %cst_33 = arith.constant 1.000000e+00 : f32
    %142 = vector.broadcast %cst_33 : f32 to vector<1x128xf32>
    %143 = arith.addf %142, %141 : vector<1x128xf32>
    %144 = arith.divf %142, %143 : vector<1x128xf32>
    %145 = vector.extract_strided_slice %144 {offsets = [0, 0], sizes = [1, 32], strides = [1, 1]} : vector<1x128xf32> to vector<1x32xf32>
    %146 = vector.extract_strided_slice %144 {offsets = [0, 32], sizes = [1, 32], strides = [1, 1]} : vector<1x128xf32> to vector<1x32xf32>
    %147 = vector.extract_strided_slice %144 {offsets = [0, 64], sizes = [1, 32], strides = [1, 1]} : vector<1x128xf32> to vector<1x32xf32>
    %148 = vector.extract_strided_slice %144 {offsets = [0, 96], sizes = [1, 32], strides = [1, 1]} : vector<1x128xf32> to vector<1x32xf32>
    %cst_34 = arith.constant 2.000000e+00 : f32
    %149 = vector.broadcast %cst_34 : f32 to vector<1x32xf32>
    %150 = arith.mulf %149, %148 : vector<1x32xf32>
    %cst_35 = arith.constant 1.000000e+00 : f32
    %151 = vector.broadcast %cst_35 : f32 to vector<1x32xf32>
    %152 = arith.subf %150, %151 : vector<1x32xf32>
    %153 = arith.mulf %146, %113 : vector<1x32xf32>
    %154 = arith.mulf %145, %152 : vector<1x32xf32>
    %155 = arith.addf %153, %154 : vector<1x32xf32>
    %156 = math.tanh %155 : vector<1x32xf32>
    %157 = arith.mulf %147, %156 : vector<1x32xf32>
    %158 = tpu.concatenate %157, %136 in 1 : vector<1x32xf32>, vector<1x32xf32> -> vector<1x64xf32>
    %cst_36 = arith.constant dense<0.000000e+00> : vector<1x128xf32>
    %159 = tpu.matmul %158, %6, %cst_36 {dimension_numbers = #tpu.dot_dimension_numbers<[1], [0], [0], [1], [0, 0, 1, 1], [], []>} : vector<1x64xf32>, vector<64x128xf32>, vector<1x128xf32> -> vector<1x128xf32>
    %160 = arith.addf %159, %4 : vector<1x128xf32>
    %161 = arith.negf %160 : vector<1x128xf32>
    %162 = math.exp %161 : vector<1x128xf32>
    %cst_37 = arith.constant 1.000000e+00 : f32
    %163 = vector.broadcast %cst_37 : f32 to vector<1x128xf32>
    %164 = arith.addf %163, %162 : vector<1x128xf32>
    %165 = arith.divf %163, %164 : vector<1x128xf32>
    %166 = vector.extract_strided_slice %165 {offsets = [0, 0], sizes = [1, 32], strides = [1, 1]} : vector<1x128xf32> to vector<1x32xf32>
    %167 = vector.extract_strided_slice %165 {offsets = [0, 32], sizes = [1, 32], strides = [1, 1]} : vector<1x128xf32> to vector<1x32xf32>
    %168 = vector.extract_strided_slice %165 {offsets = [0, 64], sizes = [1, 32], strides = [1, 1]} : vector<1x128xf32> to vector<1x32xf32>
    %169 = vector.extract_strided_slice %165 {offsets = [0, 96], sizes = [1, 32], strides = [1, 1]} : vector<1x128xf32> to vector<1x32xf32>
    %cst_38 = arith.constant 2.000000e+00 : f32
    %170 = vector.broadcast %cst_38 : f32 to vector<1x32xf32>
    %171 = arith.mulf %170, %169 : vector<1x32xf32>
    %cst_39 = arith.constant 1.000000e+00 : f32
    %172 = vector.broadcast %cst_39 : f32 to vector<1x32xf32>
    %173 = arith.subf %171, %172 : vector<1x32xf32>
    %174 = arith.mulf %167, %134 : vector<1x32xf32>
    %175 = arith.mulf %166, %173 : vector<1x32xf32>
    %176 = arith.addf %174, %175 : vector<1x32xf32>
    %177 = math.tanh %176 : vector<1x32xf32>
    %178 = arith.mulf %168, %177 : vector<1x32xf32>
    %179 = vector.extract_strided_slice %9 {offsets = [4, 0], sizes = [1, 128], strides = [1, 1]} : vector<8x128xf32> to vector<1x128xf32>
    %cst_40 = arith.constant dense<0.000000e+00> : vector<1x128xf32>
    %180 = tpu.matmul %157, %5, %cst_40 {dimension_numbers = #tpu.dot_dimension_numbers<[1], [0], [0], [1], [0, 0, 1, 1], [], []>} : vector<1x32xf32>, vector<32x128xf32>, vector<1x128xf32> -> vector<1x128xf32>
    %181 = arith.addf %179, %180 : vector<1x128xf32>
    %182 = arith.negf %181 : vector<1x128xf32>
    %183 = math.exp %182 : vector<1x128xf32>
    %cst_41 = arith.constant 1.000000e+00 : f32
    %184 = vector.broadcast %cst_41 : f32 to vector<1x128xf32>
    %185 = arith.addf %184, %183 : vector<1x128xf32>
    %186 = arith.divf %184, %185 : vector<1x128xf32>
    %187 = vector.extract_strided_slice %186 {offsets = [0, 0], sizes = [1, 32], strides = [1, 1]} : vector<1x128xf32> to vector<1x32xf32>
    %188 = vector.extract_strided_slice %186 {offsets = [0, 32], sizes = [1, 32], strides = [1, 1]} : vector<1x128xf32> to vector<1x32xf32>
    %189 = vector.extract_strided_slice %186 {offsets = [0, 64], sizes = [1, 32], strides = [1, 1]} : vector<1x128xf32> to vector<1x32xf32>
    %190 = vector.extract_strided_slice %186 {offsets = [0, 96], sizes = [1, 32], strides = [1, 1]} : vector<1x128xf32> to vector<1x32xf32>
    %cst_42 = arith.constant 2.000000e+00 : f32
    %191 = vector.broadcast %cst_42 : f32 to vector<1x32xf32>
    %192 = arith.mulf %191, %190 : vector<1x32xf32>
    %cst_43 = arith.constant 1.000000e+00 : f32
    %193 = vector.broadcast %cst_43 : f32 to vector<1x32xf32>
    %194 = arith.subf %192, %193 : vector<1x32xf32>
    %195 = arith.mulf %188, %155 : vector<1x32xf32>
    %196 = arith.mulf %187, %194 : vector<1x32xf32>
    %197 = arith.addf %195, %196 : vector<1x32xf32>
    %198 = math.tanh %197 : vector<1x32xf32>
    %199 = arith.mulf %189, %198 : vector<1x32xf32>
    %200 = tpu.concatenate %199, %178 in 1 : vector<1x32xf32>, vector<1x32xf32> -> vector<1x64xf32>
    %cst_44 = arith.constant dense<0.000000e+00> : vector<1x128xf32>
    %201 = tpu.matmul %200, %6, %cst_44 {dimension_numbers = #tpu.dot_dimension_numbers<[1], [0], [0], [1], [0, 0, 1, 1], [], []>} : vector<1x64xf32>, vector<64x128xf32>, vector<1x128xf32> -> vector<1x128xf32>
    %202 = arith.addf %201, %4 : vector<1x128xf32>
    %203 = arith.negf %202 : vector<1x128xf32>
    %204 = math.exp %203 : vector<1x128xf32>
    %cst_45 = arith.constant 1.000000e+00 : f32
    %205 = vector.broadcast %cst_45 : f32 to vector<1x128xf32>
    %206 = arith.addf %205, %204 : vector<1x128xf32>
    %207 = arith.divf %205, %206 : vector<1x128xf32>
    %208 = vector.extract_strided_slice %207 {offsets = [0, 0], sizes = [1, 32], strides = [1, 1]} : vector<1x128xf32> to vector<1x32xf32>
    %209 = vector.extract_strided_slice %207 {offsets = [0, 32], sizes = [1, 32], strides = [1, 1]} : vector<1x128xf32> to vector<1x32xf32>
    %210 = vector.extract_strided_slice %207 {offsets = [0, 64], sizes = [1, 32], strides = [1, 1]} : vector<1x128xf32> to vector<1x32xf32>
    %211 = vector.extract_strided_slice %207 {offsets = [0, 96], sizes = [1, 32], strides = [1, 1]} : vector<1x128xf32> to vector<1x32xf32>
    %cst_46 = arith.constant 2.000000e+00 : f32
    %212 = vector.broadcast %cst_46 : f32 to vector<1x32xf32>
    %213 = arith.mulf %212, %211 : vector<1x32xf32>
    %cst_47 = arith.constant 1.000000e+00 : f32
    %214 = vector.broadcast %cst_47 : f32 to vector<1x32xf32>
    %215 = arith.subf %213, %214 : vector<1x32xf32>
    %216 = arith.mulf %209, %176 : vector<1x32xf32>
    %217 = arith.mulf %208, %215 : vector<1x32xf32>
    %218 = arith.addf %216, %217 : vector<1x32xf32>
    %219 = math.tanh %218 : vector<1x32xf32>
    %220 = arith.mulf %210, %219 : vector<1x32xf32>
    %221 = vector.extract_strided_slice %9 {offsets = [5, 0], sizes = [1, 128], strides = [1, 1]} : vector<8x128xf32> to vector<1x128xf32>
    %cst_48 = arith.constant dense<0.000000e+00> : vector<1x128xf32>
    %222 = tpu.matmul %199, %5, %cst_48 {dimension_numbers = #tpu.dot_dimension_numbers<[1], [0], [0], [1], [0, 0, 1, 1], [], []>} : vector<1x32xf32>, vector<32x128xf32>, vector<1x128xf32> -> vector<1x128xf32>
    %223 = arith.addf %221, %222 : vector<1x128xf32>
    %224 = arith.negf %223 : vector<1x128xf32>
    %225 = math.exp %224 : vector<1x128xf32>
    %cst_49 = arith.constant 1.000000e+00 : f32
    %226 = vector.broadcast %cst_49 : f32 to vector<1x128xf32>
    %227 = arith.addf %226, %225 : vector<1x128xf32>
    %228 = arith.divf %226, %227 : vector<1x128xf32>
    %229 = vector.extract_strided_slice %228 {offsets = [0, 0], sizes = [1, 32], strides = [1, 1]} : vector<1x128xf32> to vector<1x32xf32>
    %230 = vector.extract_strided_slice %228 {offsets = [0, 32], sizes = [1, 32], strides = [1, 1]} : vector<1x128xf32> to vector<1x32xf32>
    %231 = vector.extract_strided_slice %228 {offsets = [0, 64], sizes = [1, 32], strides = [1, 1]} : vector<1x128xf32> to vector<1x32xf32>
    %232 = vector.extract_strided_slice %228 {offsets = [0, 96], sizes = [1, 32], strides = [1, 1]} : vector<1x128xf32> to vector<1x32xf32>
    %cst_50 = arith.constant 2.000000e+00 : f32
    %233 = vector.broadcast %cst_50 : f32 to vector<1x32xf32>
    %234 = arith.mulf %233, %232 : vector<1x32xf32>
    %cst_51 = arith.constant 1.000000e+00 : f32
    %235 = vector.broadcast %cst_51 : f32 to vector<1x32xf32>
    %236 = arith.subf %234, %235 : vector<1x32xf32>
    %237 = arith.mulf %230, %197 : vector<1x32xf32>
    %238 = arith.mulf %229, %236 : vector<1x32xf32>
    %239 = arith.addf %237, %238 : vector<1x32xf32>
    %240 = math.tanh %239 : vector<1x32xf32>
    %241 = arith.mulf %231, %240 : vector<1x32xf32>
    %242 = tpu.concatenate %241, %220 in 1 : vector<1x32xf32>, vector<1x32xf32> -> vector<1x64xf32>
    %cst_52 = arith.constant dense<0.000000e+00> : vector<1x128xf32>
    %243 = tpu.matmul %242, %6, %cst_52 {dimension_numbers = #tpu.dot_dimension_numbers<[1], [0], [0], [1], [0, 0, 1, 1], [], []>} : vector<1x64xf32>, vector<64x128xf32>, vector<1x128xf32> -> vector<1x128xf32>
    %244 = arith.addf %243, %4 : vector<1x128xf32>
    %245 = arith.negf %244 : vector<1x128xf32>
    %246 = math.exp %245 : vector<1x128xf32>
    %cst_53 = arith.constant 1.000000e+00 : f32
    %247 = vector.broadcast %cst_53 : f32 to vector<1x128xf32>
    %248 = arith.addf %247, %246 : vector<1x128xf32>
    %249 = arith.divf %247, %248 : vector<1x128xf32>
    %250 = vector.extract_strided_slice %249 {offsets = [0, 0], sizes = [1, 32], strides = [1, 1]} : vector<1x128xf32> to vector<1x32xf32>
    %251 = vector.extract_strided_slice %249 {offsets = [0, 32], sizes = [1, 32], strides = [1, 1]} : vector<1x128xf32> to vector<1x32xf32>
    %252 = vector.extract_strided_slice %249 {offsets = [0, 64], sizes = [1, 32], strides = [1, 1]} : vector<1x128xf32> to vector<1x32xf32>
    %253 = vector.extract_strided_slice %249 {offsets = [0, 96], sizes = [1, 32], strides = [1, 1]} : vector<1x128xf32> to vector<1x32xf32>
    %cst_54 = arith.constant 2.000000e+00 : f32
    %254 = vector.broadcast %cst_54 : f32 to vector<1x32xf32>
    %255 = arith.mulf %254, %253 : vector<1x32xf32>
    %cst_55 = arith.constant 1.000000e+00 : f32
    %256 = vector.broadcast %cst_55 : f32 to vector<1x32xf32>
    %257 = arith.subf %255, %256 : vector<1x32xf32>
    %258 = arith.mulf %251, %218 : vector<1x32xf32>
    %259 = arith.mulf %250, %257 : vector<1x32xf32>
    %260 = arith.addf %258, %259 : vector<1x32xf32>
    %261 = math.tanh %260 : vector<1x32xf32>
    %262 = arith.mulf %252, %261 : vector<1x32xf32>
    %263 = vector.extract_strided_slice %9 {offsets = [6, 0], sizes = [1, 128], strides = [1, 1]} : vector<8x128xf32> to vector<1x128xf32>
    %cst_56 = arith.constant dense<0.000000e+00> : vector<1x128xf32>
    %264 = tpu.matmul %241, %5, %cst_56 {dimension_numbers = #tpu.dot_dimension_numbers<[1], [0], [0], [1], [0, 0, 1, 1], [], []>} : vector<1x32xf32>, vector<32x128xf32>, vector<1x128xf32> -> vector<1x128xf32>
    %265 = arith.addf %263, %264 : vector<1x128xf32>
    %266 = arith.negf %265 : vector<1x128xf32>
    %267 = math.exp %266 : vector<1x128xf32>
    %cst_57 = arith.constant 1.000000e+00 : f32
    %268 = vector.broadcast %cst_57 : f32 to vector<1x128xf32>
    %269 = arith.addf %268, %267 : vector<1x128xf32>
    %270 = arith.divf %268, %269 : vector<1x128xf32>
    %271 = vector.extract_strided_slice %270 {offsets = [0, 0], sizes = [1, 32], strides = [1, 1]} : vector<1x128xf32> to vector<1x32xf32>
    %272 = vector.extract_strided_slice %270 {offsets = [0, 32], sizes = [1, 32], strides = [1, 1]} : vector<1x128xf32> to vector<1x32xf32>
    %273 = vector.extract_strided_slice %270 {offsets = [0, 64], sizes = [1, 32], strides = [1, 1]} : vector<1x128xf32> to vector<1x32xf32>
    %274 = vector.extract_strided_slice %270 {offsets = [0, 96], sizes = [1, 32], strides = [1, 1]} : vector<1x128xf32> to vector<1x32xf32>
    %cst_58 = arith.constant 2.000000e+00 : f32
    %275 = vector.broadcast %cst_58 : f32 to vector<1x32xf32>
    %276 = arith.mulf %275, %274 : vector<1x32xf32>
    %cst_59 = arith.constant 1.000000e+00 : f32
    %277 = vector.broadcast %cst_59 : f32 to vector<1x32xf32>
    %278 = arith.subf %276, %277 : vector<1x32xf32>
    %279 = arith.mulf %272, %239 : vector<1x32xf32>
    %280 = arith.mulf %271, %278 : vector<1x32xf32>
    %281 = arith.addf %279, %280 : vector<1x32xf32>
    %282 = math.tanh %281 : vector<1x32xf32>
    %283 = arith.mulf %273, %282 : vector<1x32xf32>
    %284 = tpu.concatenate %283, %262 in 1 : vector<1x32xf32>, vector<1x32xf32> -> vector<1x64xf32>
    %cst_60 = arith.constant dense<0.000000e+00> : vector<1x128xf32>
    %285 = tpu.matmul %284, %6, %cst_60 {dimension_numbers = #tpu.dot_dimension_numbers<[1], [0], [0], [1], [0, 0, 1, 1], [], []>} : vector<1x64xf32>, vector<64x128xf32>, vector<1x128xf32> -> vector<1x128xf32>
    %286 = arith.addf %285, %4 : vector<1x128xf32>
    %287 = arith.negf %286 : vector<1x128xf32>
    %288 = math.exp %287 : vector<1x128xf32>
    %cst_61 = arith.constant 1.000000e+00 : f32
    %289 = vector.broadcast %cst_61 : f32 to vector<1x128xf32>
    %290 = arith.addf %289, %288 : vector<1x128xf32>
    %291 = arith.divf %289, %290 : vector<1x128xf32>
    %292 = vector.extract_strided_slice %291 {offsets = [0, 0], sizes = [1, 32], strides = [1, 1]} : vector<1x128xf32> to vector<1x32xf32>
    %293 = vector.extract_strided_slice %291 {offsets = [0, 32], sizes = [1, 32], strides = [1, 1]} : vector<1x128xf32> to vector<1x32xf32>
    %294 = vector.extract_strided_slice %291 {offsets = [0, 64], sizes = [1, 32], strides = [1, 1]} : vector<1x128xf32> to vector<1x32xf32>
    %295 = vector.extract_strided_slice %291 {offsets = [0, 96], sizes = [1, 32], strides = [1, 1]} : vector<1x128xf32> to vector<1x32xf32>
    %cst_62 = arith.constant 2.000000e+00 : f32
    %296 = vector.broadcast %cst_62 : f32 to vector<1x32xf32>
    %297 = arith.mulf %296, %295 : vector<1x32xf32>
    %cst_63 = arith.constant 1.000000e+00 : f32
    %298 = vector.broadcast %cst_63 : f32 to vector<1x32xf32>
    %299 = arith.subf %297, %298 : vector<1x32xf32>
    %300 = arith.mulf %293, %260 : vector<1x32xf32>
    %301 = arith.mulf %292, %299 : vector<1x32xf32>
    %302 = arith.addf %300, %301 : vector<1x32xf32>
    %303 = math.tanh %302 : vector<1x32xf32>
    %304 = arith.mulf %294, %303 : vector<1x32xf32>
    %305 = vector.extract_strided_slice %9 {offsets = [7, 0], sizes = [1, 128], strides = [1, 1]} : vector<8x128xf32> to vector<1x128xf32>
    %cst_64 = arith.constant dense<0.000000e+00> : vector<1x128xf32>
    %306 = tpu.matmul %283, %5, %cst_64 {dimension_numbers = #tpu.dot_dimension_numbers<[1], [0], [0], [1], [0, 0, 1, 1], [], []>} : vector<1x32xf32>, vector<32x128xf32>, vector<1x128xf32> -> vector<1x128xf32>
    %307 = arith.addf %305, %306 : vector<1x128xf32>
    %308 = arith.negf %307 : vector<1x128xf32>
    %309 = math.exp %308 : vector<1x128xf32>
    %cst_65 = arith.constant 1.000000e+00 : f32
    %310 = vector.broadcast %cst_65 : f32 to vector<1x128xf32>
    %311 = arith.addf %310, %309 : vector<1x128xf32>
    %312 = arith.divf %310, %311 : vector<1x128xf32>
    %313 = vector.extract_strided_slice %312 {offsets = [0, 0], sizes = [1, 32], strides = [1, 1]} : vector<1x128xf32> to vector<1x32xf32>
    %314 = vector.extract_strided_slice %312 {offsets = [0, 32], sizes = [1, 32], strides = [1, 1]} : vector<1x128xf32> to vector<1x32xf32>
    %315 = vector.extract_strided_slice %312 {offsets = [0, 64], sizes = [1, 32], strides = [1, 1]} : vector<1x128xf32> to vector<1x32xf32>
    %316 = vector.extract_strided_slice %312 {offsets = [0, 96], sizes = [1, 32], strides = [1, 1]} : vector<1x128xf32> to vector<1x32xf32>
    %cst_66 = arith.constant 2.000000e+00 : f32
    %317 = vector.broadcast %cst_66 : f32 to vector<1x32xf32>
    %318 = arith.mulf %317, %316 : vector<1x32xf32>
    %cst_67 = arith.constant 1.000000e+00 : f32
    %319 = vector.broadcast %cst_67 : f32 to vector<1x32xf32>
    %320 = arith.subf %318, %319 : vector<1x32xf32>
    %321 = arith.mulf %314, %281 : vector<1x32xf32>
    %322 = arith.mulf %313, %320 : vector<1x32xf32>
    %323 = arith.addf %321, %322 : vector<1x32xf32>
    %324 = math.tanh %323 : vector<1x32xf32>
    %325 = arith.mulf %315, %324 : vector<1x32xf32>
    %326 = tpu.concatenate %325, %304 in 1 : vector<1x32xf32>, vector<1x32xf32> -> vector<1x64xf32>
    %cst_68 = arith.constant dense<0.000000e+00> : vector<1x128xf32>
    %327 = tpu.matmul %326, %6, %cst_68 {dimension_numbers = #tpu.dot_dimension_numbers<[1], [0], [0], [1], [0, 0, 1, 1], [], []>} : vector<1x64xf32>, vector<64x128xf32>, vector<1x128xf32> -> vector<1x128xf32>
    %328 = arith.addf %327, %4 : vector<1x128xf32>
    %329 = arith.negf %328 : vector<1x128xf32>
    %330 = math.exp %329 : vector<1x128xf32>
    %cst_69 = arith.constant 1.000000e+00 : f32
    %331 = vector.broadcast %cst_69 : f32 to vector<1x128xf32>
    %332 = arith.addf %331, %330 : vector<1x128xf32>
    %333 = arith.divf %331, %332 : vector<1x128xf32>
    %334 = vector.extract_strided_slice %333 {offsets = [0, 0], sizes = [1, 32], strides = [1, 1]} : vector<1x128xf32> to vector<1x32xf32>
    %335 = vector.extract_strided_slice %333 {offsets = [0, 32], sizes = [1, 32], strides = [1, 1]} : vector<1x128xf32> to vector<1x32xf32>
    %336 = vector.extract_strided_slice %333 {offsets = [0, 64], sizes = [1, 32], strides = [1, 1]} : vector<1x128xf32> to vector<1x32xf32>
    %337 = vector.extract_strided_slice %333 {offsets = [0, 96], sizes = [1, 32], strides = [1, 1]} : vector<1x128xf32> to vector<1x32xf32>
    %cst_70 = arith.constant 2.000000e+00 : f32
    %338 = vector.broadcast %cst_70 : f32 to vector<1x32xf32>
    %339 = arith.mulf %338, %337 : vector<1x32xf32>
    %cst_71 = arith.constant 1.000000e+00 : f32
    %340 = vector.broadcast %cst_71 : f32 to vector<1x32xf32>
    %341 = arith.subf %339, %340 : vector<1x32xf32>
    %342 = arith.mulf %335, %302 : vector<1x32xf32>
    %343 = arith.mulf %334, %341 : vector<1x32xf32>
    %344 = arith.addf %342, %343 : vector<1x32xf32>
    %345 = math.tanh %344 : vector<1x32xf32>
    %346 = arith.mulf %336, %345 : vector<1x32xf32>
    %347 = vector.extract_strided_slice %2 {offsets = [2, 0], sizes = [1, 32], strides = [1, 1]} : vector<4x128xf32> to vector<1x32xf32>
    %348 = vector.extract_strided_slice %2 {offsets = [3, 0], sizes = [1, 1], strides = [1, 1]} : vector<4x128xf32> to vector<1x1xf32>
    %349 = arith.mulf %346, %347 : vector<1x32xf32>
    %cst_72 = arith.constant dense<0.000000e+00> : vector<1xf32>
    %350 = vector.multi_reduction <add>, %349, %cst_72 [1] : vector<1x32xf32> to vector<1xf32>
    %351 = vector.shape_cast %350 : vector<1xf32> to vector<1x1xf32>
    %352 = arith.addf %351, %348 : vector<1x1xf32>
    %353 = arith.negf %352 : vector<1x1xf32>
    %354 = math.exp %353 : vector<1x1xf32>
    %cst_73 = arith.constant 1.000000e+00 : f32
    %355 = vector.broadcast %cst_73 : f32 to vector<1x1xf32>
    %356 = arith.addf %355, %354 : vector<1x1xf32>
    %357 = arith.divf %355, %356 : vector<1x1xf32>
    %c0_74 = arith.constant 0 : index
    %c0_75 = arith.constant 0 : index
    %358 = vector.load %arg3[%c0_74, %c0_75] : memref<1x1xf32, #tpu.memory_space<vmem>>, vector<1x1xf32>
    tpu.vector_store %arg3[%c0_74, %c0_75], %357 {strides = array<i32>} : memref<1x1xf32, #tpu.memory_space<vmem>>, vector<1x1xf32>,
    return
  }
}

</mosaic_0001>

<bundles_post_ra>
// kernel: lstm_discriminator_forward.1
= control target key start
LH: loop header
LB: loop body
LE: loop exit
PB: predicated region body
PF: predicated region fallthrough
CT: control target
= control target key end

     0   :  { %8 = vsyncpa [#allocation3], 0  ;;  %s1879_s0 = inlined_call_operand.hbm [shape: f32[8,10], index: 0, kind: input, shape index: {}]   ;;  %s1880_s1 = inlined_call_operand.hbm [shape: f32[20,128], index: 1, kind: input, shape index: {}]   ;;  %s1881_s2 = inlined_call_operand.hbm [shape: f32[96,128], index: 2, kind: input, shape index: {}]   ;;  %s1882_s3 = inlined_call_operand.hbm [shape: f32[1,1], index: 3, kind: output, shape index: {}]  }
   0x1   :  { %9 = vsyncpa [#allocation6], 0  ;;  %s26_s14 = sshll.u32 %s1880_s1, 4  ;;  %s27_s14 = int_to_ptr.hbm [resolvable:$true] %s26_s14 }
   0x2   :  { %10 = vsyncpa [#allocation4], 0  ;;  %s1547_s15 = smov [#allocation5]   ;;  %s16_s19 = sshll.u32 %s1879_s0, 4  ;;  %s17_s19 = int_to_ptr.hbm [resolvable:$true] %s16_s19 }
   0x3   :  { %s28_s16 = sshll.u32 %s1547_s15, 4  ;;  %s1548_s20 = smov 128   ;;  %s29_s16 = int_to_ptr.vmem [resolvable:$true] %s28_s16 }
   0x4   :  { %s1549_s21 = smov 8   ;;  %s1550_s22 = smov [#allocation2]  }
   0x5   :  { %34 = dma.hbm_to_vmem [thread:$0]  %s27_s14, 384, %s29_s16, [#allocation6], %s1548_s20, %s1548_s20, %s1549_s21  }
   0x6   :  { %s18_s23 = sshll.u32 %s1550_s22, 4  ;;  %s39_s26 = sshll.u32 %s1881_s2, 4  ;;  %s19_s23 = int_to_ptr.vmem [resolvable:$true] %s18_s23  ;;  %s40_s26 = int_to_ptr.hbm [resolvable:$true] %s39_s26 }
   0x7   :  { %21 = dma.hbm_to_vmem [thread:$0]  %s17_s19, 128, %s19_s23, [#allocation3]  }
   0x8   :  { %s1551_s1 = smov [#allocation7]  }
   0x9   :  { %s41_s27 = sshll.u32 %s1551_s1, 4  ;;  %s42_s27 = int_to_ptr.vmem [resolvable:$true] %s41_s27 }
   0xa   :  { %47 = dma.hbm_to_vmem [thread:$0]  %s40_s26, 1536, %s42_s27, [#allocation6], %s1548_s20, %s1548_s20, %s1549_s21  }
   0xb   :  { %1541 = dma.done.wait [#allocation3], 128  }
   0xc   :  { %1542 = vsyncadd [#allocation3], 4294967168 }
   0xd   :  { %1543 = dma.done.wait [#allocation6], 1920  }
   0xe   :  { %1544 = vsyncadd [#allocation6], 4294965376  ;;  %vm81_vm0 = vcmask 1041408   ;;  %v1586_v0 = vld [vmem:[#allocation7 + $0x18] sm:$0xff]  ;;  %v62_v1 = vld [vmem:[#allocation5 + $0x8] sm:$0x3] }
   0xf   :  { %v1588_v2 = vld [vmem:[#allocation7 + $0x10] sm:$0xff]  ;;  %121 = vmatpush.msra.mxu1 %v1586_v0  ;;  %1284 = vmatpush.msk.msra.mxu0 %vm81_vm0, %v62_v1  ;;  %v61_v3 = vld [vmem:[#allocation5] sm:$0xff]  ;;  %v60_v4 = vld [vmem:[#allocation2] sm:$0xff]  ;;  %vm77_vm1 = vcmask 80896   ;;  %v1552_v7 = vmov 0.0   ;;  %s1553_s0 = smov 32  }
  0x10   :  { %v1591_v5 = vld [vmem:[#allocation7 + $0x8] sm:$0xff]  ;;  %252 = vmatpush.msra.mxu3 %v1586_v0  ;;  %v1595_v6 = vld [vmem:[#allocation7] sm:$0xff]  ;;  %v1610_v8 = vld [vmem:[#allocation5 + $0x10] sm:$0xf]  ;;  %s1554_s2 = smov 64   ;;  %vm105_vm6 = vcmask 261120  }
  0x11   :  { %122 = vmatpush.msra.mxu1 %v1588_v2  ;;  %100 = vmatpush.msra.mxu0 %v61_v3  ;;  %v76_v9 = vperm.slane %v1610_v8, 0  ;;  %v1622_v35 = vld [vmem:[#allocation7 + $0x58] sm:$0xff]  ;;  %v1624_v36 = vld [vmem:[#allocation7 + $0x50] sm:$0xff]  ;;  %v1628_v37 = vld [vmem:[#allocation7 + $0x48] sm:$0xff]  ;;  %vm176_vm7 = vcmask 523264   ;;  %v1691_v47 = vrot.slane %v1610_v8, 1 }
  0x12   :  { %1285 = vmatmul.msk.f32.vlgmr.msra.gmra.mxu0 %vm77_vm1, %v60_v4  ;;  %253 = vmatpush.msra.mxu3 %v1588_v2  ;;  %v1633_v38 = vld [vmem:[#allocation7 + $0x40] sm:$0xff]  ;;  %v1638_v39 = vld [vmem:[#allocation7 + $0x38] sm:$0xff]  ;;  %v1643_v40 = vld [vmem:[#allocation7 + $0x30] sm:$0xff]  ;;  %s1555_s28 = smov 96   ;;  %s1556_s29 = smov [#allocation8]  }
  0x13   :  { %123 = vmatpush.msra.mxu1 %v1591_v5  ;;  %188 = vmatpush.msra.mxu2 %v1622_v35  ;;  %v1648_v41 = vld [vmem:[#allocation7 + $0x28] sm:$0xff]  ;;  %v1658_v44 = vld [vmem:[#allocation7 + $0x20] sm:$0xff]  ;;  %s1271_s30 = sshll.u32 %s1556_s29, 4  ;;  %s1273_s6 = sshll.u32 %s1882_s3, 4  ;;  %s1272_s30 = int_to_ptr.vmem [resolvable:$true] %s1271_s30  ;;  %s1274_s6 = int_to_ptr.hbm [resolvable:$true] %s1273_s6 }
  0x14   :  { %254 = vmatpush.msra.mxu3 %v1591_v5  ;;  %327 = vmatpush.msrb.mxu0 %v1622_v35 }
  0x15   :  { %124 = vmatpush.msra.mxu1 %v1595_v6  ;;  %189 = vmatpush.msra.mxu2 %v1624_v36 }
  0x16   :  { %125 = vmatmul.f32.vlgmr.msra.gmra.mxu1 %v1552_v7  ;;  %255 = vmatpush.msra.mxu3 %v1595_v6 }
  0x17   :  { %394 = vmatpush.msrb.mxu1 %v1586_v0  ;;  %328 = vmatpush.msrb.mxu0 %v1624_v36 }
  0x18   :  { %469 = vmatpush.msrb.mxu3 %v1622_v35  ;;  %190 = vmatpush.msra.mxu2 %v1628_v37 }
  0x19   :  { %395 = vmatpush.msrb.mxu1 %v1588_v2  ;;  %329 = vmatpush.msrb.mxu0 %v1628_v37 }
  0x1a   :  { %470 = vmatpush.msrb.mxu3 %v1624_v36  ;;  %191 = vmatpush.msra.mxu2 %v1633_v38 }
  0x1b   :  { %396 = vmatpush.msrb.mxu1 %v1591_v5  ;;  %330 = vmatpush.msrb.mxu0 %v1633_v38 }
  0x1c   :  { %471 = vmatpush.msrb.mxu3 %v1628_v37  ;;  %192 = vmatpush.msra.mxu2 %v1638_v39 }
  0x1d   :  { %397 = vmatpush.msrb.mxu1 %v1595_v6  ;;  %331 = vmatpush.msrb.mxu0 %v1638_v39 }
  0x1e   :  { %472 = vmatpush.msrb.mxu3 %v1633_v38  ;;  %193 = vmatpush.msra.mxu2 %v1643_v40 }
  0x1f   :  { %536 = vmatpush.msra.mxu1 %v1586_v0  ;;  %332 = vmatpush.msrb.mxu0 %v1643_v40 }
  0x20   :  { %473 = vmatpush.msrb.mxu3 %v1638_v39  ;;  %194 = vmatpush.msra.mxu2 %v1648_v41 }
  0x21   :  { %537 = vmatpush.msra.mxu1 %v1588_v2  ;;  %333 = vmatpush.msrb.mxu0 %v1648_v41 }
  0x22   :  { %474 = vmatpush.msrb.mxu3 %v1643_v40  ;;  %195 = vmatpush.msra.mxu2 %v1658_v44 }
  0x23   :  { %538 = vmatpush.msra.mxu1 %v1591_v5  ;;  %334 = vmatpush.msrb.mxu0 %v1658_v44 }
  0x24   :  { %475 = vmatpush.msrb.mxu3 %v1648_v41  ;;  %611 = vmatpush.msrb.mxu2 %v1622_v35 }
  0x25   :  { %539 = vmatpush.msra.mxu1 %v1595_v6  ;;  %678 = vmatpush.msra.mxu0 %v1586_v0 }
  0x26   :  { %476 = vmatpush.msrb.mxu3 %v1658_v44  ;;  %612 = vmatpush.msrb.mxu2 %v1624_v36 }
  0x27   :  { %679 = vmatpush.msra.mxu0 %v1588_v2 }
  0x28   :  { %613 = vmatpush.msrb.mxu2 %v1628_v37 }
  0x29   :  { %680 = vmatpush.msra.mxu0 %v1591_v5 }
  0x2a   :  { %614 = vmatpush.msrb.mxu2 %v1633_v38 }
  0x2b   :  { %681 = vmatpush.msra.mxu0 %v1595_v6 }
  0x2c   :  { %615 = vmatpush.msrb.mxu2 %v1638_v39 }
  0x2e   :  { %616 = vmatpush.msrb.mxu2 %v1643_v40 }
  0x30   :  { %617 = vmatpush.msrb.mxu2 %v1648_v41 }
  0x32   :  { %618 = vmatpush.msrb.mxu2 %v1658_v44 }
  0x8f   :  { %v102_v10 = vpop.f32.mrf.mxu0 }
  0x90   :  { %v1613_v11 = vadd.f32 %v102_v10, %v76_v9 }
  0x93   :  { %v126_v12 = vpop.f32.mrf.mxu1 }
  0x94   :  { %v129_v13 = vadd.f32 %v126_v12, %v1613_v11 }
  0x96   :  { %v1286_v14 = vmul.f32 -1.442695, %v129_v13 }
  0x98   :  { %1344 = vpow2.f32 %v1286_v14 }
  0x9e   :  { %v1345_v15 = vpop.eup %1344 }
  0x9f   :  { %v133_v16 = vadd.f32 1.0, %v1345_v15 }
  0xa1   :  { %1346 = vrcp.f32 %v133_v16  ;;  %v145_v20 = vand.u32 2147483648, %v133_v16  ;;  %v143_v22 = vand.u32 2147483647, %v133_v16  ;;  %vm139_vm3 = vweird.f32 %v133_v16 }
  0xa3   :  { %v146_v24 = vor.u32 1.1754944e-38, %v145_v20  ;;  %vm144_vm5 = vcmp.eq.f32.partialorder %v143_v22, 8.507059e+37 }
  0xa7   :  { %v1347_v17 = vpop.eup %1346 }
  0xa8   :  { %v135_v18 = vmul.f32 %v1347_v17, %v133_v16  ;;  %vm140_vm2 = vweird.f32 %v1347_v17 }
  0xa9   :  { %vm141_vm4 = vmor %vm139_vm3, %vm140_vm2 }
  0xaa   :  { %v136_v19 = vsub.f32 1.0, %v135_v18 }
  0xac   :  { %v137_v21 = vmul.f32 %v1347_v17, %v136_v19 }
  0xae   :  { %v138_v23 = vadd.f32 %v1347_v17, %v137_v21 }
  0xb0   :  { %v142_v25 = vsel %vm141_vm4, %v1347_v17, %v138_v23 }
  0xb1   :  { %v147_v26 = vsel %vm144_vm5, %v146_v24, %v142_v25 }
  0xb2   :  { %v149_v27 = vmul.f32 2.0, %v147_v26  ;;  %v151_v31 = vmul.f32 0.0, %v147_v26 }
  0xb4   :  { %v1287_v28 = vadd.f32 -1.0, %v149_v27 }
  0xb6   :  { %153 = vrot.lane.b32.xlu0 %v1287_v28, %s1553_s0 }
 0x128   :  { %v154_v29 = vpop.permute.xlu0 %153 }
 0x129   :  { %v156_v30 = vmul.f32 %v154_v29, %v147_v26 }
 0x12b   :  { %158 = vrot.lane.b32.xlu0 %v156_v30, %s1553_s0 }
 0x19d   :  { %v159_v32 = vpop.permute.xlu0 %158 }
 0x19e   :  { %v1618_v33 = vadd.f32 %v159_v32, %v151_v31 }
 0x1a0   :  { %1348 = vtanh.f32 %v1618_v33  ;;  %v286_v31 = vrot.slane %v1618_v33, 7 }
 0x1a6   :  { %v1349_v34 = vpop.eup %1348 }
 0x1a7   :  { %164 = vrot.lane.b32.xlu1 %v1349_v34, %s1553_s0 }
 0x219   :  { %v165_v42 = vpop.permute.xlu1 %164 }
 0x21a   :  { %v167_v43 = vmul.f32 %v165_v42, %v147_v26 }
 0x21c   :  { %169 = vrot.lane.b32.xlu1 %v167_v43, %s1554_s2 }
 0x28e   :  { %v170_v45 = vpop.permute.xlu1 %169 }
 0x28f   :  { %1291 = vmatmul.msk.f32.vlgmr.msra.gmra.mxu3 %vm105_vm6, %v170_v45  ;;  %v172_v46 = vsel %vm105_vm6, %v170_v45, 0.0 }
 0x290   :  { %1288 = vmatmul.msk.f32.vlgmr.msra.gmra.mxu2 %vm176_vm7, %v172_v46  ;;  %820 = vmatpush.msra.mxu3 %v1586_v0 }
 0x291   :  { %1179 = vmatpush.msra.mxu2 %v1622_v35 }
 0x292   :  { %821 = vmatpush.msra.mxu3 %v1588_v2 }
 0x293   :  { %1180 = vmatpush.msra.mxu2 %v1624_v36 }
 0x294   :  { %822 = vmatpush.msra.mxu3 %v1591_v5 }
 0x295   :  { %1181 = vmatpush.msra.mxu2 %v1628_v37 }
 0x296   :  { %823 = vmatpush.msra.mxu3 %v1595_v6 }
 0x297   :  { %1182 = vmatpush.msra.mxu2 %v1633_v38 }
 0x299   :  { %1183 = vmatpush.msra.mxu2 %v1638_v39 }
 0x29b   :  { %1184 = vmatpush.msra.mxu2 %v1643_v40 }
 0x29d   :  { %1185 = vmatpush.msra.mxu2 %v1648_v41 }
 0x29f   :  { %1186 = vmatpush.msra.mxu2 %v1658_v44 }
 0x312   :  { %v257_v48 = vpop.f32.mrf.mxu3 }
 0x313   :  { %v261_v49 = vrot.slane %v257_v48, 7  ;;  %v197_v50 = vpop.f32.mrf.mxu2 }
 0x314   :  { %v198_v51 = vadd.f32 %v197_v50, %v1691_v47 }
 0x315   :  { %v263_v52 = vadd.f32 %v261_v49, %v1613_v11 }
 0x316   :  { %v1289_v53 = vmul.f32 -1.442695, %v198_v51 }
 0x317   :  { %v1292_v54 = vmul.f32 -1.442695, %v263_v52 }
 0x318   :  { %1350 = vpow2.f32 %v1289_v53 }
 0x319   :  { %1352 = vpow2.f32 %v1292_v54 }
 0x31e   :  { %v1351_v55 = vpop.eup %1350 }
 0x31f   :  { %v1353_v56 = vpop.eup %1352  ;;  %v203_v57 = vadd.f32 1.0, %v1351_v55 }
 0x320   :  { %v267_v58 = vadd.f32 1.0, %v1353_v56 }
 0x321   :  { %1354 = vrcp.f32 %v203_v57  ;;  %v215_v3 = vand.u32 2147483648, %v203_v57  ;;  %v213_v7 = vand.u32 2147483647, %v203_v57  ;;  %vm209_vm9 = vweird.f32 %v203_v57 }
 0x322   :  { %1356 = vrcp.f32 %v267_v58  ;;  %v279_v13 = vand.u32 2147483648, %v267_v58  ;;  %vm273_vm13 = vweird.f32 %v267_v58  ;;  %v277_v15 = vand.u32 2147483647, %v267_v58 }
 0x323   :  { %v216_v10 = vor.u32 1.1754944e-38, %v215_v3  ;;  %vm214_vm12 = vcmp.eq.f32.partialorder %v213_v7, 8.507059e+37 }
 0x324   :  { %v280_v19 = vor.u32 1.1754944e-38, %v279_v13  ;;  %vm278_vm15 = vcmp.eq.f32.partialorder %v277_v15, 8.507059e+37 }
 0x327   :  { %v1355_v59 = vpop.eup %1354 }
 0x328   :  { %v1357_v60 = vpop.eup %1356  ;;  %v205_v61 = vmul.f32 %v1355_v59, %v203_v57  ;;  %vm210_vm8 = vweird.f32 %v1355_v59 }
 0x329   :  { %v269_v62 = vmul.f32 %v1357_v60, %v267_v58  ;;  %vm274_vm10 = vweird.f32 %v1357_v60  ;;  %vm211_vm11 = vmor %vm209_vm9, %vm210_vm8 }
 0x32a   :  { %v206_v63 = vsub.f32 1.0, %v205_v61  ;;  %vm275_vm14 = vmor %vm273_vm13, %vm274_vm10 }
 0x32b   :  { %v270_v1 = vsub.f32 1.0, %v269_v62 }
 0x32c   :  { %v207_v4 = vmul.f32 %v1355_v59, %v206_v63 }
 0x32d   :  { %v271_v8 = vmul.f32 %v1357_v60, %v270_v1 }
 0x32e   :  { %v208_v9 = vadd.f32 %v1355_v59, %v207_v4 }
 0x32f   :  { %v272_v12 = vadd.f32 %v1357_v60, %v271_v8 }
 0x330   :  { %v212_v14 = vsel %vm211_vm11, %v1355_v59, %v208_v9 }
 0x331   :  { %v217_v16 = vsel %vm214_vm12, %v216_v10, %v212_v14  ;;  %v276_v18 = vsel %vm275_vm14, %v1357_v60, %v272_v12 }
 0x332   :  { %v219_v17 = vmul.f32 2.0, %v217_v16  ;;  %v281_v21 = vsel %vm278_vm15, %v280_v19, %v276_v18  ;;  %v221_v28 = vmul.f32 0.0, %v217_v16 }
 0x333   :  { %v283_v22 = vmul.f32 2.0, %v281_v21  ;;  %v288_v32 = vmul.f32 %v286_v31, %v281_v21 }
 0x334   :  { %v1290_v20 = vadd.f32 -1.0, %v219_v17 }
 0x335   :  { %v1293_v23 = vadd.f32 -1.0, %v283_v22 }
 0x336   :  { %223 = vrot.lane.b32.xlu2 %v1290_v20, %s1553_s0 }
 0x33e   :  { %290 = vrot.lane.b32.xlu2 %v1293_v23, %s1553_s0 }
 0x390   :  { %v224_v24 = vpop.permute.xlu2 %223 }
 0x391   :  { %v226_v25 = vmul.f32 %v224_v24, %v217_v16 }
 0x393   :  { %228 = vrot.lane.b32.xlu0 %v226_v25, %s1553_s0 }
 0x398   :  { %v291_v26 = vpop.permute.xlu2 %290 }
 0x399   :  { %v293_v27 = vmul.f32 %v291_v26, %v281_v21 }
 0x39b   :  { %295 = vrot.lane.b32.xlu1 %v293_v27, %s1553_s0 }
 0x405   :  { %v229_v29 = vpop.permute.xlu0 %228 }
 0x406   :  { %v1699_v30 = vadd.f32 %v229_v29, %v221_v28 }
 0x408   :  { %1358 = vtanh.f32 %v1699_v30 }
 0x40d   :  { %v296_v34 = vpop.permute.xlu1 %295 }
 0x40e   :  { %v1359_v42 = vpop.eup %1358  ;;  %v1703_v43 = vadd.f32 %v296_v34, %v288_v32 }
 0x40f   :  { %234 = vrot.lane.b32.xlu2 %v1359_v42, %s1553_s0 }
 0x410   :  { %1360 = vtanh.f32 %v1703_v43 }
 0x416   :  { %v1361_v45 = vpop.eup %1360 }
 0x417   :  { %301 = vrot.lane.b32.xlu0 %v1361_v45, %s1553_s0 }
 0x469   :  { %v235_v46 = vpop.permute.xlu2 %234 }
 0x46a   :  { %v237_v48 = vmul.f32 %v235_v46, %v217_v16 }
 0x46c   :  { %v310_v49 = vrot.slane %v237_v48, 7 }
 0x46e   :  { %311 = vrot.lane.b32.xlu2 %v310_v49, %s1555_s28  ;;  %v428_v49 = vrot.slane %v1703_v43, 7 }
 0x489   :  { %v302_v50 = vpop.permute.xlu0 %301 }
 0x48a   :  { %v304_v33 = vmul.f32 %v302_v50, %v281_v21 }
 0x48c   :  { %v377_v51 = vrot.slane %v304_v33, 1  ;;  %306 = vrot.lane.b32.xlu1 %v304_v33, %s1554_s2 }
 0x48e   :  { %378 = vrot.lane.b32.xlu0 %v377_v51, %s1554_s2 }
 0x4c8   :  { %v312_v52 = vpop.permute.xlu2 %311 }
 0x4fe   :  { %v307_v53 = vpop.permute.xlu1 %306 }
 0x4ff   :  { %v314_v54 = vsel %vm105_vm6, %v307_v53, %v312_v52 }
 0x500   :  { %v316_v55 = vrot.slane %v314_v54, 1  ;;  %v379_v56 = vpop.permute.xlu0 %378 }
 0x501   :  { %1297 = vmatmul.msk.f32.vlgmr.msrb.gmra.mxu1 %vm105_vm6, %v379_v56 }
 0x502   :  { %1294 = vmatmul.msk.f32.vlgmr.msrb.gmra.mxu0 %vm176_vm7, %v316_v55  ;;  %753 = vmatpush.msrb.mxu1 %v1622_v35 }
 0x503   :  { %895 = vmatpush.msrb.mxu0 %v1622_v35 }
 0x504   :  { %754 = vmatpush.msrb.mxu1 %v1624_v36 }
 0x505   :  { %896 = vmatpush.msrb.mxu0 %v1624_v36 }
 0x506   :  { %755 = vmatpush.msrb.mxu1 %v1628_v37 }
 0x507   :  { %897 = vmatpush.msrb.mxu0 %v1628_v37 }
 0x508   :  { %756 = vmatpush.msrb.mxu1 %v1633_v38 }
 0x509   :  { %898 = vmatpush.msrb.mxu0 %v1633_v38 }
 0x50a   :  { %757 = vmatpush.msrb.mxu1 %v1638_v39 }
 0x50b   :  { %899 = vmatpush.msrb.mxu0 %v1638_v39 }
 0x50c   :  { %758 = vmatpush.msrb.mxu1 %v1643_v40 }
 0x50d   :  { %900 = vmatpush.msrb.mxu0 %v1643_v40 }
 0x50e   :  { %759 = vmatpush.msrb.mxu1 %v1648_v41 }
 0x50f   :  { %901 = vmatpush.msrb.mxu0 %v1648_v41 }
 0x510   :  { %760 = vmatpush.msrb.mxu1 %v1658_v44 }
 0x511   :  { %902 = vmatpush.msrb.mxu0 %v1658_v44 }
 0x57e   :  { %v399_v57 = vpop.f32.mrf.mxu1 }
 0x57f   :  { %v403_v58 = vrot.slane %v399_v57, 6  ;;  %v336_v59 = vpop.f32.mrf.mxu0 }
 0x580   :  { %v337_v60 = vadd.f32 %v336_v59, %v1691_v47 }
 0x581   :  { %v405_v61 = vadd.f32 %v403_v58, %v1613_v11 }
 0x582   :  { %v1295_v62 = vmul.f32 -1.442695, %v337_v60 }
 0x583   :  { %v1298_v63 = vmul.f32 -1.442695, %v405_v61 }
 0x584   :  { %1362 = vpow2.f32 %v1295_v62 }
 0x585   :  { %1364 = vpow2.f32 %v1298_v63 }
 0x58a   :  { %v1363_v1 = vpop.eup %1362 }
 0x58b   :  { %v1365_v3 = vpop.eup %1364  ;;  %v342_v4 = vadd.f32 1.0, %v1363_v1 }
 0x58c   :  { %v409_v7 = vadd.f32 1.0, %v1365_v3 }
 0x58d   :  { %1366 = vrcp.f32 %v342_v4  ;;  %v354_v15 = vand.u32 2147483648, %v342_v4  ;;  %v352_v17 = vand.u32 2147483647, %v342_v4  ;;  %vm348_vm2 = vweird.f32 %v342_v4 }
 0x58e   :  { %1368 = vrcp.f32 %v409_v7  ;;  %v421_v18 = vand.u32 2147483648, %v409_v7  ;;  %v419_v20 = vand.u32 2147483647, %v409_v7  ;;  %vm415_vm4 = vweird.f32 %v409_v7 }
 0x58f   :  { %v355_v22 = vor.u32 1.1754944e-38, %v354_v15  ;;  %vm353_vm5 = vcmp.eq.f32.partialorder %v352_v17, 8.507059e+37 }
 0x590   :  { %v422_v25 = vor.u32 1.1754944e-38, %v421_v18  ;;  %vm420_vm9 = vcmp.eq.f32.partialorder %v419_v20, 8.507059e+37 }
 0x593   :  { %v1367_v8 = vpop.eup %1366 }
 0x594   :  { %v1369_v9 = vpop.eup %1368  ;;  %v344_v10 = vmul.f32 %v1367_v8, %v342_v4  ;;  %vm349_vm0 = vweird.f32 %v1367_v8 }
 0x595   :  { %v411_v12 = vmul.f32 %v1369_v9, %v409_v7  ;;  %vm416_vm1 = vweird.f32 %v1369_v9  ;;  %vm350_vm3 = vmor %vm348_vm2, %vm349_vm0 }
 0x596   :  { %v345_v13 = vsub.f32 1.0, %v344_v10  ;;  %vm417_vm8 = vmor %vm415_vm4, %vm416_vm1 }
 0x597   :  { %v412_v14 = vsub.f32 1.0, %v411_v12 }
 0x598   :  { %v346_v16 = vmul.f32 %v1367_v8, %v345_v13 }
 0x599   :  { %v413_v19 = vmul.f32 %v1369_v9, %v412_v14 }
 0x59a   :  { %v347_v21 = vadd.f32 %v1367_v8, %v346_v16 }
 0x59b   :  { %v414_v23 = vadd.f32 %v1369_v9, %v413_v19 }
 0x59c   :  { %v351_v24 = vsel %vm350_vm3, %v1367_v8, %v347_v21 }
 0x59d   :  { %v356_v26 = vsel %vm353_vm5, %v355_v22, %v351_v24  ;;  %v418_v27 = vsel %vm417_vm8, %v1369_v9, %v414_v23 }
 0x59e   :  { %v358_v28 = vmul.f32 2.0, %v356_v26  ;;  %v423_v29 = vsel %vm420_vm9, %v422_v25, %v418_v27  ;;  %v360_v53 = vmul.f32 %v356_v26, %v1699_v30 }
 0x59f   :  { %v425_v31 = vmul.f32 2.0, %v423_v29  ;;  %v430_v50 = vmul.f32 %v428_v49, %v423_v29 }
 0x5a0   :  { %v1296_v32 = vadd.f32 -1.0, %v358_v28 }
 0x5a1   :  { %v1299_v34 = vadd.f32 -1.0, %v425_v31 }
 0x5a2   :  { %362 = vrot.lane.b32.xlu1 %v1296_v32, %s1553_s0 }
 0x5a3   :  { %432 = vrot.lane.b32.xlu2 %v1299_v34, %s1553_s0 }
 0x5fd   :  { %v433_v42 = vpop.permute.xlu2 %432 }
 0x5fe   :  { %v435_v45 = vmul.f32 %v433_v42, %v423_v29 }
 0x600   :  { %437 = vrot.lane.b32.xlu1 %v435_v45, %s1553_s0 }
 0x614   :  { %v363_v46 = vpop.permute.xlu1 %362 }
 0x615   :  { %v365_v48 = vmul.f32 %v363_v46, %v356_v26 }
 0x617   :  { %367 = vrot.lane.b32.xlu0 %v365_v48, %s1553_s0 }
 0x672   :  { %v438_v33 = vpop.permute.xlu1 %437 }
 0x673   :  { %v1737_v51 = vadd.f32 %v438_v33, %v430_v50 }
 0x675   :  { %1370 = vtanh.f32 %v1737_v51  ;;  %v570_v50 = vrot.slane %v1737_v51, 7 }
 0x67b   :  { %v1371_v52 = vpop.eup %1370 }
 0x67c   :  { %443 = vrot.lane.b32.xlu0 %v1371_v52, %s1553_s0 }
 0x689   :  { %v368_v54 = vpop.permute.xlu0 %367 }
 0x68a   :  { %v1742_v55 = vadd.f32 %v368_v54, %v360_v53 }
 0x68c   :  { %1372 = vtanh.f32 %v1742_v55 }
 0x692   :  { %v1373_v56 = vpop.eup %1372 }
 0x693   :  { %373 = vrot.lane.b32.xlu2 %v1373_v56, %s1553_s0 }
 0x6ed   :  { %v374_v43 = vpop.permute.xlu2 %373 }
 0x6ee   :  { %v376_v57 = vmul.f32 %v374_v43, %v356_v26  ;;  %v444_v58 = vpop.permute.xlu0 %443 }
 0x6ef   :  { %v446_v59 = vmul.f32 %v444_v58, %v423_v29 }
 0x6f0   :  { %v452_v60 = vrot.slane %v376_v57, 6 }
 0x6f1   :  { %v519_v61 = vrot.slane %v446_v59, 2  ;;  %448 = vrot.lane.b32.xlu1 %v446_v59, %s1554_s2 }
 0x6f2   :  { %453 = vrot.lane.b32.xlu2 %v452_v60, %s1555_s28 }
 0x6f3   :  { %520 = vrot.lane.b32.xlu0 %v519_v61, %s1554_s2 }
 0x74c   :  { %v454_v30 = vpop.permute.xlu2 %453 }
 0x763   :  { %v449_v62 = vpop.permute.xlu1 %448 }
 0x764   :  { %v456_v63 = vsel %vm105_vm6, %v449_v62, %v454_v30 }
 0x765   :  { %v458_v1 = vrot.slane %v456_v63, 2  ;;  %v521_v3 = vpop.permute.xlu0 %520 }
 0x766   :  { %1303 = vmatmul.msk.f32.vlgmr.msra.gmra.mxu1 %vm105_vm6, %v521_v3 }
 0x767   :  { %1300 = vmatmul.msk.f32.vlgmr.msrb.gmra.mxu3 %vm176_vm7, %v458_v1  ;;  %1104 = vmatpush.msra.mxu1 %v1586_v0 }
 0x768   :  { %1037 = vmatpush.msrb.mxu3 %v1622_v35 }
 0x769   :  { %1105 = vmatpush.msra.mxu1 %v1588_v2 }
 0x76a   :  { %1038 = vmatpush.msrb.mxu3 %v1624_v36 }
 0x76b   :  { %1106 = vmatpush.msra.mxu1 %v1591_v5 }
 0x76c   :  { %1039 = vmatpush.msrb.mxu3 %v1628_v37 }
 0x76d   :  { %1107 = vmatpush.msra.mxu1 %v1595_v6 }
 0x76e   :  { %1040 = vmatpush.msrb.mxu3 %v1633_v38 }
 0x770   :  { %1041 = vmatpush.msrb.mxu3 %v1638_v39 }
 0x772   :  { %1042 = vmatpush.msrb.mxu3 %v1643_v40 }
 0x774   :  { %1043 = vmatpush.msrb.mxu3 %v1648_v41 }
 0x776   :  { %1044 = vmatpush.msrb.mxu3 %v1658_v44 }
 0x7e3   :  { %v541_v35 = vpop.f32.mrf.mxu1 }
 0x7e4   :  { %v545_v4 = vrot.slane %v541_v35, 5 }
 0x7e6   :  { %v547_v36 = vadd.f32 %v545_v4, %v1613_v11 }
 0x7e8   :  { %v1304_v7 = vmul.f32 -1.442695, %v547_v36 }
 0x7ea   :  { %1374 = vpow2.f32 %v1304_v7  ;;  %v478_v8 = vpop.f32.mrf.mxu3 }
 0x7eb   :  { %v479_v37 = vadd.f32 %v478_v8, %v1691_v47 }
 0x7ed   :  { %v1301_v9 = vmul.f32 -1.442695, %v479_v37 }
 0x7ef   :  { %1376 = vpow2.f32 %v1301_v9 }
 0x7f0   :  { %v1375_v38 = vpop.eup %1374 }
 0x7f1   :  { %v551_v10 = vadd.f32 1.0, %v1375_v38 }
 0x7f3   :  { %1378 = vrcp.f32 %v551_v10  ;;  %v563_v13 = vand.u32 2147483648, %v551_v10  ;;  %v561_v16 = vand.u32 2147483647, %v551_v10  ;;  %vm557_vm11 = vweird.f32 %v551_v10 }
 0x7f5   :  { %v1377_v39 = vpop.eup %1376  ;;  %v564_v20 = vor.u32 1.1754944e-38, %v563_v13  ;;  %vm562_vm13 = vcmp.eq.f32.partialorder %v561_v16, 8.507059e+37 }
 0x7f6   :  { %v484_v40 = vadd.f32 1.0, %v1377_v39 }
 0x7f8   :  { %1380 = vrcp.f32 %v484_v40  ;;  %v496_v22 = vand.u32 2147483648, %v484_v40  ;;  %v494_v25 = vand.u32 2147483647, %v484_v40  ;;  %vm490_vm15 = vweird.f32 %v484_v40 }
 0x7f9   :  { %v1379_v41 = vpop.eup %1378 }
 0x7fa   :  { %v553_v12 = vmul.f32 %v1379_v41, %v551_v10  ;;  %vm558_vm10 = vweird.f32 %v1379_v41  ;;  %v497_v29 = vor.u32 1.1754944e-38, %v496_v22  ;;  %vm495_vm1 = vcmp.eq.f32.partialorder %v494_v25, 8.507059e+37 }
 0x7fb   :  { %vm559_vm12 = vmor %vm557_vm11, %vm558_vm10 }
 0x7fc   :  { %v554_v44 = vsub.f32 1.0, %v553_v12 }
 0x7fe   :  { %v1381_v14 = vpop.eup %1380  ;;  %v555_v15 = vmul.f32 %v1379_v41, %v554_v44 }
 0x7ff   :  { %v486_v17 = vmul.f32 %v1381_v14, %v484_v40  ;;  %vm491_vm14 = vweird.f32 %v1381_v14 }
 0x800   :  { %v556_v18 = vadd.f32 %v1379_v41, %v555_v15  ;;  %vm492_vm0 = vmor %vm490_vm15, %vm491_vm14 }
 0x801   :  { %v487_v19 = vsub.f32 1.0, %v486_v17 }
 0x802   :  { %v560_v21 = vsel %vm559_vm12, %v1379_v41, %v556_v18 }
 0x803   :  { %v565_v23 = vsel %vm562_vm13, %v564_v20, %v560_v21  ;;  %v488_v24 = vmul.f32 %v1381_v14, %v487_v19 }
 0x804   :  { %v567_v26 = vmul.f32 2.0, %v565_v23  ;;  %v572_v33 = vmul.f32 %v570_v50, %v565_v23 }
 0x805   :  { %v489_v27 = vadd.f32 %v1381_v14, %v488_v24 }
 0x806   :  { %v1305_v28 = vadd.f32 -1.0, %v567_v26 }
 0x807   :  { %v493_v31 = vsel %vm492_vm0, %v1381_v14, %v489_v27 }
 0x808   :  { %574 = vrot.lane.b32.xlu2 %v1305_v28, %s1553_s0  ;;  %v498_v32 = vsel %vm495_vm1, %v497_v29, %v493_v31 }
 0x809   :  { %v500_v34 = vmul.f32 2.0, %v498_v32  ;;  %v502_v56 = vmul.f32 %v498_v32, %v1742_v55 }
 0x80b   :  { %v1302_v42 = vadd.f32 -1.0, %v500_v34 }
 0x80d   :  { %504 = vrot.lane.b32.xlu1 %v1302_v42, %s1553_s0 }
 0x862   :  { %v575_v45 = vpop.permute.xlu2 %574 }
 0x863   :  { %v577_v46 = vmul.f32 %v575_v45, %v565_v23 }
 0x865   :  { %579 = vrot.lane.b32.xlu1 %v577_v46, %s1553_s0 }
 0x87f   :  { %v505_v48 = vpop.permute.xlu1 %504 }
 0x880   :  { %v507_v49 = vmul.f32 %v505_v48, %v498_v32 }
 0x882   :  { %509 = vrot.lane.b32.xlu0 %v507_v49, %s1553_s0 }
 0x8d7   :  { %v580_v52 = vpop.permute.xlu1 %579 }
 0x8d8   :  { %v1771_v53 = vadd.f32 %v580_v52, %v572_v33 }
 0x8da   :  { %1382 = vtanh.f32 %v1771_v53  ;;  %v712_v33 = vrot.slane %v1771_v53, 7 }
 0x8e0   :  { %v1383_v54 = vpop.eup %1382 }
 0x8e1   :  { %585 = vrot.lane.b32.xlu0 %v1383_v54, %s1553_s0 }
 0x8f4   :  { %v510_v43 = vpop.permute.xlu0 %509 }
 0x8f5   :  { %v1776_v57 = vadd.f32 %v510_v43, %v502_v56 }
 0x8f7   :  { %1384 = vtanh.f32 %v1776_v57 }
 0x8fd   :  { %v1385_v58 = vpop.eup %1384 }
 0x8fe   :  { %515 = vrot.lane.b32.xlu2 %v1385_v58, %s1553_s0 }
 0x953   :  { %v586_v51 = vpop.permute.xlu0 %585 }
 0x954   :  { %v588_v59 = vmul.f32 %v586_v51, %v565_v23 }
 0x956   :  { %v661_v60 = vrot.slane %v588_v59, 3  ;;  %590 = vrot.lane.b32.xlu1 %v588_v59, %s1554_s2 }
 0x958   :  { %662 = vrot.lane.b32.xlu0 %v661_v60, %s1554_s2  ;;  %v516_v61 = vpop.permute.xlu2 %515 }
 0x959   :  { %v518_v30 = vmul.f32 %v516_v61, %v498_v32 }
 0x95b   :  { %v594_v62 = vrot.slane %v518_v30, 5 }
 0x95d   :  { %595 = vrot.lane.b32.xlu2 %v594_v62, %s1555_s28 }
 0x9b7   :  { %v596_v55 = vpop.permute.xlu2 %595 }
 0x9c8   :  { %v591_v63 = vpop.permute.xlu1 %590 }
 0x9c9   :  { %v598_v1 = vsel %vm105_vm6, %v591_v63, %v596_v55 }
 0x9ca   :  { %v600_v3 = vrot.slane %v598_v1, 3  ;;  %v663_v35 = vpop.permute.xlu0 %662 }
 0x9cb   :  { %1309 = vmatmul.msk.f32.vlgmr.msra.gmra.mxu0 %vm105_vm6, %v663_v35 }
 0x9cc   :  { %1306 = vmatmul.msk.f32.vlgmr.msrb.gmra.mxu2 %vm176_vm7, %v600_v3  ;;  %962 = vmatpush.msra.mxu0 %v1586_v0 }
 0x9ce   :  { %963 = vmatpush.msra.mxu0 %v1588_v2 }
 0x9d0   :  { %964 = vmatpush.msra.mxu0 %v1591_v5 }
 0x9d2   :  { %965 = vmatpush.msra.mxu0 %v1595_v6 }
 0xa48   :  { %v683_v4 = vpop.f32.mrf.mxu0 }
 0xa49   :  { %v687_v36 = vrot.slane %v683_v4, 4 }
 0xa4b   :  { %v689_v7 = vadd.f32 %v687_v36, %v1613_v11 }
 0xa4d   :  { %v1310_v8 = vmul.f32 -1.442695, %v689_v7 }
 0xa4f   :  { %1386 = vpow2.f32 %v1310_v8  ;;  %v620_v37 = vpop.f32.mrf.mxu2 }
 0xa50   :  { %v621_v9 = vadd.f32 %v620_v37, %v1691_v47 }
 0xa52   :  { %v1307_v38 = vmul.f32 -1.442695, %v621_v9 }
 0xa54   :  { %1388 = vpow2.f32 %v1307_v38 }
 0xa55   :  { %v1387_v10 = vpop.eup %1386 }
 0xa56   :  { %v693_v39 = vadd.f32 1.0, %v1387_v10 }
 0xa58   :  { %1390 = vrcp.f32 %v693_v39  ;;  %v705_v41 = vand.u32 2147483648, %v693_v39  ;;  %v703_v13 = vand.u32 2147483647, %v693_v39  ;;  %vm699_vm3 = vweird.f32 %v693_v39 }
 0xa5a   :  { %v1389_v0 = vpop.eup %1388  ;;  %v706_v17 = vor.u32 1.1754944e-38, %v705_v41  ;;  %vm704_vm5 = vcmp.eq.f32.partialorder %v703_v13, 8.507059e+37 }
 0xa5b   :  { %v626_v2 = vadd.f32 1.0, %v1389_v0 }
 0xa5d   :  { %1392 = vrcp.f32 %v626_v2  ;;  %v638_v19 = vand.u32 2147483648, %v626_v2  ;;  %v636_v22 = vand.u32 2147483647, %v626_v2  ;;  %vm632_vm9 = vweird.f32 %v626_v2 }
 0xa5e   :  { %v1391_v5 = vpop.eup %1390 }
 0xa5f   :  { %v695_v40 = vmul.f32 %v1391_v5, %v693_v39  ;;  %vm700_vm2 = vweird.f32 %v1391_v5  ;;  %v639_v26 = vor.u32 1.1754944e-38, %v638_v19  ;;  %vm637_vm11 = vcmp.eq.f32.partialorder %v636_v22, 8.507059e+37 }
 0xa60   :  { %vm701_vm4 = vmor %vm699_vm3, %vm700_vm2 }
 0xa61   :  { %v696_v6 = vsub.f32 1.0, %v695_v40 }
 0xa63   :  { %v1393_v12 = vpop.eup %1392  ;;  %v697_v44 = vmul.f32 %v1391_v5, %v696_v6 }
 0xa64   :  { %v628_v14 = vmul.f32 %v1393_v12, %v626_v2  ;;  %vm633_vm8 = vweird.f32 %v1393_v12 }
 0xa65   :  { %v698_v15 = vadd.f32 %v1391_v5, %v697_v44  ;;  %vm634_vm10 = vmor %vm632_vm9, %vm633_vm8 }
 0xa66   :  { %v629_v16 = vsub.f32 1.0, %v628_v14 }
 0xa67   :  { %v702_v18 = vsel %vm701_vm4, %v1391_v5, %v698_v15 }
 0xa68   :  { %v707_v20 = vsel %vm704_vm5, %v706_v17, %v702_v18  ;;  %v630_v21 = vmul.f32 %v1393_v12, %v629_v16 }
 0xa69   :  { %v709_v23 = vmul.f32 2.0, %v707_v20  ;;  %v714_v52 = vmul.f32 %v712_v33, %v707_v20 }
 0xa6a   :  { %v631_v24 = vadd.f32 %v1393_v12, %v630_v21 }
 0xa6b   :  { %v1311_v25 = vadd.f32 -1.0, %v709_v23 }
 0xa6c   :  { %v635_v27 = vsel %vm634_vm10, %v1393_v12, %v631_v24 }
 0xa6d   :  { %716 = vrot.lane.b32.xlu1 %v1311_v25, %s1553_s0  ;;  %v640_v28 = vsel %vm637_vm11, %v639_v26, %v635_v27 }
 0xa6e   :  { %v642_v29 = vmul.f32 2.0, %v640_v28  ;;  %v644_v46 = vmul.f32 %v640_v28, %v1776_v57 }
 0xa70   :  { %v1308_v31 = vadd.f32 -1.0, %v642_v29 }
 0xa72   :  { %646 = vrot.lane.b32.xlu2 %v1308_v31, %s1553_s0 }
 0xacc   :  { %v647_v32 = vpop.permute.xlu2 %646 }
 0xacd   :  { %v649_v34 = vmul.f32 %v647_v32, %v640_v28 }
 0xacf   :  { %651 = vrot.lane.b32.xlu1 %v649_v34, %s1553_s0 }
 0xadf   :  { %v717_v42 = vpop.permute.xlu1 %716 }
 0xae0   :  { %v719_v45 = vmul.f32 %v717_v42, %v707_v20 }
 0xae2   :  { %721 = vrot.lane.b32.xlu0 %v719_v45, %s1553_s0 }
 0xb41   :  { %v652_v48 = vpop.permute.xlu1 %651 }
 0xb42   :  { %v1797_v49 = vadd.f32 %v652_v48, %v644_v46 }
 0xb44   :  { %1394 = vtanh.f32 %v1797_v49 }
 0xb4a   :  { %v1395_v50 = vpop.eup %1394 }
 0xb4b   :  { %657 = vrot.lane.b32.xlu0 %v1395_v50, %s1553_s0 }
 0xb54   :  { %v722_v54 = vpop.permute.xlu0 %721 }
 0xb55   :  { %v1802_v56 = vadd.f32 %v722_v54, %v714_v52 }
 0xb57   :  { %1396 = vtanh.f32 %v1802_v56  ;;  %v854_v34 = vrot.slane %v1802_v56, 7 }
 0xb5d   :  { %v1397_v43 = vpop.eup %1396 }
 0xb5e   :  { %727 = vrot.lane.b32.xlu2 %v1397_v43, %s1553_s0 }
 0xbb8   :  { %v728_v57 = vpop.permute.xlu2 %727 }
 0xbb9   :  { %v730_v58 = vmul.f32 %v728_v57, %v707_v20 }
 0xbbb   :  { %v803_v51 = vrot.slane %v730_v58, 4  ;;  %732 = vrot.lane.b32.xlu2 %v730_v58, %s1554_s2 }
 0xbbd   :  { %v658_v59 = vpop.permute.xlu0 %657  ;;  %804 = vrot.lane.b32.xlu1 %v803_v51, %s1554_s2 }
 0xbbe   :  { %v660_v60 = vmul.f32 %v658_v59, %v640_v28 }
 0xbc0   :  { %v736_v61 = vrot.slane %v660_v60, 4 }
 0xbc2   :  { %737 = vrot.lane.b32.xlu0 %v736_v61, %s1555_s28 }
 0xc15   :  { %v733_v30 = vpop.permute.xlu2 %732 }
 0xc2f   :  { %v805_v53 = vpop.permute.xlu1 %804 }
 0xc30   :  { %1315 = vmatmul.msk.f32.vlgmr.msra.gmra.mxu3 %vm105_vm6, %v805_v53 }
 0xc34   :  { %v738_v62 = vpop.permute.xlu0 %737 }
 0xc35   :  { %v740_v55 = vsel %vm105_vm6, %v733_v30, %v738_v62 }
 0xc36   :  { %v742_v63 = vrot.slane %v740_v55, 4 }
 0xc38   :  { %1312 = vmatmul.msk.f32.vlgmr.msrb.gmra.mxu1 %vm176_vm7, %v742_v63 }
 0xcb3   :  { %v825_v1 = vpop.f32.mrf.mxu3 }
 0xcb4   :  { %v829_v3 = vrot.slane %v825_v1, 3 }
 0xcb5   :  { %v762_v35 = vpop.f32.mrf.mxu1 }
 0xcb6   :  { %v831_v4 = vadd.f32 %v829_v3, %v1613_v11  ;;  %v763_v36 = vadd.f32 %v762_v35, %v1691_v47 }
 0xcb8   :  { %v1316_v7 = vmul.f32 -1.442695, %v831_v4  ;;  %v1313_v8 = vmul.f32 -1.442695, %v763_v36 }
 0xcba   :  { %1398 = vpow2.f32 %v1316_v7 }
 0xcbb   :  { %1400 = vpow2.f32 %v1313_v8 }
 0xcc0   :  { %v1399_v37 = vpop.eup %1398 }
 0xcc1   :  { %v1401_v9 = vpop.eup %1400  ;;  %v835_v38 = vadd.f32 1.0, %v1399_v37 }
 0xcc2   :  { %v768_v10 = vadd.f32 1.0, %v1401_v9 }
 0xcc3   :  { %1402 = vrcp.f32 %v835_v38  ;;  %v847_v41 = vand.u32 2147483648, %v835_v38  ;;  %v845_v13 = vand.u32 2147483647, %v835_v38  ;;  %vm841_vm14 = vweird.f32 %v835_v38 }
 0xcc4   :  { %1404 = vrcp.f32 %v768_v10  ;;  %v780_v12 = vand.u32 2147483648, %v768_v10  ;;  %v778_v15 = vand.u32 2147483647, %v768_v10  ;;  %vm774_vm15 = vweird.f32 %v768_v10 }
 0xcc5   :  { %v848_v18 = vor.u32 1.1754944e-38, %v847_v41  ;;  %vm846_vm2 = vcmp.eq.f32.partialorder %v845_v13, 8.507059e+37 }
 0xcc6   :  { %v781_v19 = vor.u32 1.1754944e-38, %v780_v12  ;;  %vm779_vm3 = vcmp.eq.f32.partialorder %v778_v15, 8.507059e+37 }
 0xcc9   :  { %v1403_v39 = vpop.eup %1402 }
 0xcca   :  { %v1405_v0 = vpop.eup %1404  ;;  %v837_v2 = vmul.f32 %v1403_v39, %v835_v38  ;;  %vm842_vm12 = vweird.f32 %v1403_v39 }
 0xccb   :  { %v770_v5 = vmul.f32 %v1405_v0, %v768_v10  ;;  %vm775_vm13 = vweird.f32 %v1405_v0  ;;  %vm843_vm0 = vmor %vm841_vm14, %vm842_vm12 }
 0xccc   :  { %v838_v40 = vsub.f32 1.0, %v837_v2  ;;  %vm776_vm1 = vmor %vm774_vm15, %vm775_vm13 }
 0xccd   :  { %v771_v6 = vsub.f32 1.0, %v770_v5 }
 0xcce   :  { %v839_v44 = vmul.f32 %v1403_v39, %v838_v40 }
 0xccf   :  { %v772_v14 = vmul.f32 %v1405_v0, %v771_v6 }
 0xcd0   :  { %v840_v16 = vadd.f32 %v1403_v39, %v839_v44 }
 0xcd1   :  { %v773_v17 = vadd.f32 %v1405_v0, %v772_v14 }
 0xcd2   :  { %v844_v20 = vsel %vm843_vm0, %v1403_v39, %v840_v16 }
 0xcd3   :  { %v777_v21 = vsel %vm776_vm1, %v1405_v0, %v773_v17  ;;  %v849_v22 = vsel %vm846_vm2, %v848_v18, %v844_v20 }
 0xcd4   :  { %v782_v23 = vsel %vm779_vm3, %v781_v19, %v777_v21  ;;  %v851_v24 = vmul.f32 2.0, %v849_v22  ;;  %v856_v42 = vmul.f32 %v854_v34, %v849_v22 }
 0xcd5   :  { %v784_v25 = vmul.f32 2.0, %v782_v23  ;;  %v786_v50 = vmul.f32 %v782_v23, %v1797_v49 }
 0xcd6   :  { %v1317_v26 = vadd.f32 -1.0, %v851_v24 }
 0xcd7   :  { %v1314_v27 = vadd.f32 -1.0, %v784_v25 }
 0xcd8   :  { %858 = vrot.lane.b32.xlu2 %v1317_v26, %s1553_s0 }
 0xcd9   :  { %788 = vrot.lane.b32.xlu1 %v1314_v27, %s1553_s0 }
 0xd32   :  { %v859_v28 = vpop.permute.xlu2 %858 }
 0xd33   :  { %v861_v29 = vmul.f32 %v859_v28, %v849_v22 }
 0xd35   :  { %863 = vrot.lane.b32.xlu1 %v861_v29, %s1553_s0 }
 0xd4b   :  { %v789_v31 = vpop.permute.xlu1 %788 }
 0xd4c   :  { %v791_v32 = vmul.f32 %v789_v31, %v782_v23 }
 0xd4e   :  { %793 = vrot.lane.b32.xlu0 %v791_v32, %s1553_s0 }
 0xda7   :  { %v864_v45 = vpop.permute.xlu1 %863 }
 0xda8   :  { %v1819_v46 = vadd.f32 %v864_v45, %v856_v42 }
 0xdaa   :  { %1406 = vtanh.f32 %v1819_v46  ;;  %v996_v29 = vrot.slane %v1819_v46, 7 }
 0xdb0   :  { %v1407_v48 = vpop.eup %1406 }
 0xdb1   :  { %869 = vrot.lane.b32.xlu0 %v1407_v48, %s1553_s0 }
 0xdc0   :  { %v794_v33 = vpop.permute.xlu0 %793 }
 0xdc1   :  { %v1824_v52 = vadd.f32 %v794_v33, %v786_v50 }
 0xdc3   :  { %1408 = vtanh.f32 %v1824_v52 }
 0xdc9   :  { %v1409_v54 = vpop.eup %1408 }
 0xdca   :  { %799 = vrot.lane.b32.xlu2 %v1409_v54, %s1553_s0 }
 0xe23   :  { %v870_v56 = vpop.permute.xlu0 %869 }
 0xe24   :  { %v800_v43 = vpop.permute.xlu2 %799  ;;  %v872_v57 = vmul.f32 %v870_v56, %v849_v22 }
 0xe25   :  { %v802_v58 = vmul.f32 %v800_v43, %v782_v23 }
 0xe26   :  { %v945_v51 = vrot.slane %v872_v57, 5  ;;  %874 = vrot.lane.b32.xlu1 %v872_v57, %s1554_s2 }
 0xe27   :  { %v878_v59 = vrot.slane %v802_v58, 3 }
 0xe28   :  { %946 = vrot.lane.b32.xlu0 %v945_v51, %s1554_s2 }
 0xe29   :  { %879 = vrot.lane.b32.xlu2 %v878_v59, %s1555_s28 }
 0xe83   :  { %v880_v49 = vpop.permute.xlu2 %879 }
 0xe98   :  { %v875_v60 = vpop.permute.xlu1 %874 }
 0xe99   :  { %v882_v61 = vsel %vm105_vm6, %v875_v60, %v880_v49 }
 0xe9a   :  { %v884_v53 = vrot.slane %v882_v61, 5  ;;  %v947_v30 = vpop.permute.xlu0 %946 }
 0xe9c   :  { %1318 = vmatmul.msk.f32.vlgmr.msrb.gmra.mxu0 %vm176_vm7, %v884_v53 }
 0xea4   :  { %1321 = vmatmul.msk.f32.vlgmr.msra.gmra.mxu0 %vm105_vm6, %v947_v30 }
 0xf19   :  { %v904_v62 = vpop.f32.mrf.mxu0 }
 0xf1a   :  { %v905_v55 = vadd.f32 %v904_v62, %v1691_v47 }
 0xf1c   :  { %v1319_v63 = vmul.f32 -1.442695, %v905_v55 }
 0xf1e   :  { %1410 = vpow2.f32 %v1319_v63 }
 0xf21   :  { %v967_v1 = vpop.f32.mrf.mxu0 }
 0xf22   :  { %v971_v3 = vrot.slane %v967_v1, 2 }
 0xf24   :  { %v1411_v35 = vpop.eup %1410  ;;  %v973_v4 = vadd.f32 %v971_v3, %v1613_v11 }
 0xf25   :  { %v910_v36 = vadd.f32 1.0, %v1411_v35 }
 0xf26   :  { %v1322_v7 = vmul.f32 -1.442695, %v973_v4 }
 0xf27   :  { %1412 = vrcp.f32 %v910_v36  ;;  %v922_v39 = vand.u32 2147483648, %v910_v36  ;;  %v920_v2 = vand.u32 2147483647, %v910_v36  ;;  %vm916_vm5 = vweird.f32 %v910_v36 }
 0xf28   :  { %1414 = vpow2.f32 %v1322_v7 }
 0xf29   :  { %v923_v40 = vor.u32 1.1754944e-38, %v922_v39  ;;  %vm921_vm9 = vcmp.eq.f32.partialorder %v920_v2, 8.507059e+37 }
 0xf2d   :  { %v1413_v8 = vpop.eup %1412 }
 0xf2e   :  { %v1415_v37 = vpop.eup %1414  ;;  %v912_v9 = vmul.f32 %v1413_v8, %v910_v36  ;;  %vm917_vm4 = vweird.f32 %v1413_v8 }
 0xf2f   :  { %v977_v38 = vadd.f32 1.0, %v1415_v37  ;;  %vm918_vm8 = vmor %vm916_vm5, %vm917_vm4 }
 0xf30   :  { %v913_v10 = vsub.f32 1.0, %v912_v9 }
 0xf31   :  { %1416 = vrcp.f32 %v977_v38  ;;  %v989_v16 = vand.u32 2147483648, %v977_v38  ;;  %v987_v18 = vand.u32 2147483647, %v977_v38  ;;  %vm983_vm11 = vweird.f32 %v977_v38 }
 0xf32   :  { %v914_v0 = vmul.f32 %v1413_v8, %v913_v10 }
 0xf33   :  { %v990_v20 = vor.u32 1.1754944e-38, %v989_v16  ;;  %vm988_vm13 = vcmp.eq.f32.partialorder %v987_v18, 8.507059e+37 }
 0xf34   :  { %v915_v5 = vadd.f32 %v1413_v8, %v914_v0 }
 0xf36   :  { %v919_v6 = vsel %vm918_vm8, %v1413_v8, %v915_v5 }
 0xf37   :  { %v1417_v41 = vpop.eup %1416  ;;  %v924_v12 = vsel %vm921_vm9, %v923_v40, %v919_v6 }
 0xf38   :  { %v979_v44 = vmul.f32 %v1417_v41, %v977_v38  ;;  %v926_v13 = vmul.f32 2.0, %v924_v12  ;;  %vm984_vm10 = vweird.f32 %v1417_v41  ;;  %v928_v45 = vmul.f32 %v924_v12, %v1824_v52 }
 0xf39   :  { %vm985_vm12 = vmor %vm983_vm11, %vm984_vm10  ;;  %vm1238_vm10 = vcmask 253952  }
 0xf3a   :  { %v980_v14 = vsub.f32 1.0, %v979_v44  ;;  %v1320_v15 = vadd.f32 -1.0, %v926_v13 }
 0xf3c   :  { %930 = vrot.lane.b32.xlu1 %v1320_v15, %s1553_s0  ;;  %v981_v17 = vmul.f32 %v1417_v41, %v980_v14 }
 0xf3e   :  { %v982_v19 = vadd.f32 %v1417_v41, %v981_v17 }
 0xf40   :  { %v986_v21 = vsel %vm985_vm12, %v1417_v41, %v982_v19 }
 0xf41   :  { %v991_v22 = vsel %vm988_vm13, %v990_v20, %v986_v21 }
 0xf42   :  { %v993_v23 = vmul.f32 2.0, %v991_v22  ;;  %v998_v31 = vmul.f32 %v996_v29, %v991_v22 }
 0xf44   :  { %v1323_v24 = vadd.f32 -1.0, %v993_v23 }
 0xf46   :  { %1000 = vrot.lane.b32.xlu2 %v1323_v24, %s1553_s0 }
 0xfa0   :  { %v1001_v25 = vpop.permute.xlu2 %1000 }
 0xfa1   :  { %v1003_v26 = vmul.f32 %v1001_v25, %v991_v22 }
 0xfa3   :  { %1005 = vrot.lane.b32.xlu1 %v1003_v26, %s1553_s0 }
 0xfae   :  { %v931_v27 = vpop.permute.xlu1 %930 }
 0xfaf   :  { %v933_v28 = vmul.f32 %v931_v27, %v924_v12 }
 0xfb1   :  { %935 = vrot.lane.b32.xlu0 %v933_v28, %s1553_s0 }
0x1015   :  { %v1006_v32 = vpop.permute.xlu1 %1005 }
0x1016   :  { %v1841_v34 = vadd.f32 %v1006_v32, %v998_v31 }
0x1018   :  { %1418 = vtanh.f32 %v1841_v34  ;;  %v1138_v25 = vrot.slane %v1841_v34, 7 }
0x101e   :  { %v1419_v42 = vpop.eup %1418 }
0x101f   :  { %1011 = vrot.lane.b32.xlu0 %v1419_v42, %s1553_s0 }
0x1023   :  { %v936_v48 = vpop.permute.xlu0 %935 }
0x1024   :  { %v1846_v50 = vadd.f32 %v936_v48, %v928_v45 }
0x1026   :  { %1420 = vtanh.f32 %v1846_v50 }
0x102c   :  { %v1421_v33 = vpop.eup %1420 }
0x102d   :  { %941 = vrot.lane.b32.xlu2 %v1421_v33, %s1553_s0 }
0x1087   :  { %v942_v46 = vpop.permute.xlu2 %941 }
0x1088   :  { %v944_v54 = vmul.f32 %v942_v46, %v924_v12 }
0x108a   :  { %v1020_v56 = vrot.slane %v944_v54, 2 }
0x108c   :  { %1021 = vrot.lane.b32.xlu2 %v1020_v56, %s1555_s28 }
0x1091   :  { %v1012_v43 = vpop.permute.xlu0 %1011 }
0x1092   :  { %v1014_v57 = vmul.f32 %v1012_v43, %v991_v22 }
0x1094   :  { %v1087_v58 = vrot.slane %v1014_v57, 6  ;;  %1016 = vrot.lane.b32.xlu1 %v1014_v57, %s1554_s2 }
0x1096   :  { %1088 = vrot.lane.b32.xlu0 %v1087_v58, %s1554_s2 }
0x10e6   :  { %v1022_v52 = vpop.permute.xlu2 %1021 }
0x1106   :  { %v1017_v51 = vpop.permute.xlu1 %1016 }
0x1107   :  { %v1024_v59 = vsel %vm105_vm6, %v1017_v51, %v1022_v52 }
0x1108   :  { %v1026_v49 = vrot.slane %v1024_v59, 6  ;;  %v1089_v60 = vpop.permute.xlu0 %1088 }
0x1109   :  { %1327 = vmatmul.msk.f32.vlgmr.msra.gmra.mxu1 %vm105_vm6, %v1089_v60 }
0x110a   :  { %1324 = vmatmul.msk.f32.vlgmr.msrb.gmra.mxu3 %vm176_vm7, %v1026_v49 }
0x1186   :  { %v1109_v61 = vpop.f32.mrf.mxu1 }
0x1187   :  { %v1113_v53 = vrot.slane %v1109_v61, 1 }
0x1189   :  { %v1115_v30 = vadd.f32 %v1113_v53, %v1613_v11 }
0x118b   :  { %v1328_v62 = vmul.f32 -1.442695, %v1115_v30 }
0x118d   :  { %1422 = vpow2.f32 %v1328_v62  ;;  %v1046_v55 = vpop.f32.mrf.mxu3 }
0x118e   :  { %v1047_v63 = vadd.f32 %v1046_v55, %v1691_v47 }
0x1190   :  { %v1325_v1 = vmul.f32 -1.442695, %v1047_v63 }
0x1192   :  { %1424 = vpow2.f32 %v1325_v1 }
0x1193   :  { %v1423_v3 = vpop.eup %1422 }
0x1194   :  { %v1119_v35 = vadd.f32 1.0, %v1423_v3 }
0x1196   :  { %1426 = vrcp.f32 %v1119_v35  ;;  %v1131_v9 = vand.u32 2147483648, %v1119_v35  ;;  %v1129_v11 = vand.u32 2147483647, %v1119_v35  ;;  %vm1125_vm15 = vweird.f32 %v1119_v35 }
0x1198   :  { %v1425_v4 = vpop.eup %1424  ;;  %v1132_v5 = vor.u32 1.1754944e-38, %v1131_v9  ;;  %vm1130_vm1 = vcmp.eq.f32.partialorder %v1129_v11, 8.507059e+37 }
0x1199   :  { %v1052_v36 = vadd.f32 1.0, %v1425_v4 }
0x119b   :  { %1428 = vrcp.f32 %v1052_v36  ;;  %v1064_v6 = vand.u32 2147483648, %v1052_v36  ;;  %v1062_v44 = vand.u32 2147483647, %v1052_v36  ;;  %vm1058_vm3 = vweird.f32 %v1052_v36 }
0x119c   :  { %v1427_v7 = vpop.eup %1426 }
0x119d   :  { %v1121_v8 = vmul.f32 %v1427_v7, %v1119_v35  ;;  %vm1126_vm14 = vweird.f32 %v1427_v7  ;;  %v1065_v16 = vor.u32 1.1754944e-38, %v1064_v6  ;;  %vm1063_vm5 = vcmp.eq.f32.partialorder %v1062_v44, 8.507059e+37 }
0x119e   :  { %vm1127_vm0 = vmor %vm1125_vm15, %vm1126_vm14  ;;  %vm1264_vm14 = vcmask 0  }
0x119f   :  { %v1122_v37 = vsub.f32 1.0, %v1121_v8 }
0x11a1   :  { %v1429_v38 = vpop.eup %1428  ;;  %v1123_v10 = vmul.f32 %v1427_v7, %v1122_v37 }
0x11a2   :  { %v1054_v39 = vmul.f32 %v1429_v38, %v1052_v36  ;;  %vm1059_vm2 = vweird.f32 %v1429_v38  ;;  %v1444_v36 = vld [vmem:[#allocation5 + $0x10] sm:$0xf] }
0x11a3   :  { %v1124_v0 = vadd.f32 %v1427_v7, %v1123_v10  ;;  %vm1060_vm4 = vmor %vm1058_vm3, %vm1059_vm2 }
0x11a4   :  { %v1055_v2 = vsub.f32 1.0, %v1054_v39 }
0x11a5   :  { %v1128_v40 = vsel %vm1127_vm0, %v1427_v7, %v1124_v0  ;;  %v1229_v7 = vrot.slane %v1444_v36, 2 }
0x11a6   :  { %v1133_v41 = vsel %vm1130_vm1, %v1132_v5, %v1128_v40  ;;  %v1056_v12 = vmul.f32 %v1429_v38, %v1055_v2 }
0x11a7   :  { %v1135_v13 = vmul.f32 2.0, %v1133_v41  ;;  %v1140_v26 = vmul.f32 %v1138_v25, %v1133_v41 }
0x11a8   :  { %v1057_v14 = vadd.f32 %v1429_v38, %v1056_v12 }
0x11a9   :  { %v1329_v15 = vadd.f32 -1.0, %v1135_v13 }
0x11aa   :  { %v1061_v17 = vsel %vm1060_vm4, %v1429_v38, %v1057_v14 }
0x11ab   :  { %1142 = vrot.lane.b32.xlu2 %v1329_v15, %s1553_s0  ;;  %v1066_v18 = vsel %vm1063_vm5, %v1065_v16, %v1061_v17 }
0x11ac   :  { %v1068_v19 = vmul.f32 2.0, %v1066_v18  ;;  %v1070_v31 = vmul.f32 %v1066_v18, %v1846_v50 }
0x11ae   :  { %v1326_v20 = vadd.f32 -1.0, %v1068_v19 }
0x11b0   :  { %1072 = vrot.lane.b32.xlu1 %v1326_v20, %s1553_s0 }
0x1205   :  { %v1143_v21 = vpop.permute.xlu2 %1142 }
0x1206   :  { %v1145_v22 = vmul.f32 %v1143_v21, %v1133_v41 }
0x1208   :  { %1147 = vrot.lane.b32.xlu1 %v1145_v22, %s1553_s0 }
0x1222   :  { %v1073_v23 = vpop.permute.xlu1 %1072 }
0x1223   :  { %v1075_v24 = vmul.f32 %v1073_v23, %v1066_v18 }
0x1225   :  { %1077 = vrot.lane.b32.xlu0 %v1075_v24, %s1553_s0 }
0x127a   :  { %v1148_v27 = vpop.permute.xlu1 %1147 }
0x127b   :  { %v1150_v28 = vadd.f32 %v1148_v27, %v1140_v26 }
0x127d   :  { %1430 = vtanh.f32 %v1150_v28 }
0x1283   :  { %v1431_v29 = vpop.eup %1430 }
0x1284   :  { %1153 = vrot.lane.b32.xlu0 %v1431_v29, %s1553_s0 }
0x1297   :  { %v1078_v32 = vpop.permute.xlu0 %1077 }
0x1298   :  { %v1080_v42 = vadd.f32 %v1078_v32, %v1070_v31 }
0x129a   :  { %1432 = vtanh.f32 %v1080_v42 }
0x12a0   :  { %v1433_v45 = vpop.eup %1432 }
0x12a1   :  { %1083 = vrot.lane.b32.xlu2 %v1433_v45, %s1553_s0 }
0x12f6   :  { %v1154_v48 = vpop.permute.xlu0 %1153 }
0x12f7   :  { %v1156_v33 = vmul.f32 %v1154_v48, %v1133_v41  ;;  %v1242_v41 = vrot.slane %v1444_v36, 3 }
0x12f9   :  { %1158 = vrot.lane.b32.xlu1 %v1156_v33, %s1554_s2 }
0x12fb   :  { %v1084_v34 = vpop.permute.xlu2 %1083 }
0x12fc   :  { %v1086_v46 = vmul.f32 %v1084_v34, %v1066_v18 }
0x12fe   :  { %v1162_v54 = vrot.slane %v1086_v46, 1 }
0x1300   :  { %1163 = vrot.lane.b32.xlu2 %v1162_v54, %s1555_s28 }
0x135a   :  { %v1164_v56 = vpop.permute.xlu2 %1163 }
0x136b   :  { %v1159_v43 = vpop.permute.xlu1 %1158 }
0x136c   :  { %v1166_v57 = vsel %vm105_vm6, %v1159_v43, %v1164_v56 }
0x136d   :  { %v1168_v50 = vrot.slane %v1166_v57, 7 }
0x136f   :  { %1330 = vmatmul.msk.f32.vlgmr.msra.gmra.mxu2 %vm176_vm7, %v1168_v50 }
0x13f2   :  { %v1188_v58 = vpop.f32.mrf.mxu2 }
0x13f3   :  { %v1189_v52 = vadd.f32 %v1188_v58, %v1691_v47 }
0x13f5   :  { %v1331_v51 = vmul.f32 -1.442695, %v1189_v52 }
0x13f7   :  { %1434 = vpow2.f32 %v1331_v51 }
0x13fd   :  { %v1435_v59 = vpop.eup %1434 }
0x13fe   :  { %v1194_v49 = vadd.f32 1.0, %v1435_v59 }
0x1400   :  { %1436 = vrcp.f32 %v1194_v49  ;;  %v1206_v30 = vand.u32 2147483648, %v1194_v49  ;;  %v1204_v55 = vand.u32 2147483647, %v1194_v49  ;;  %vm1200_vm6 = vweird.f32 %v1194_v49 }
0x1402   :  { %v1207_v1 = vor.u32 1.1754944e-38, %v1206_v30  ;;  %vm1205_vm7 = vcmp.eq.f32.partialorder %v1204_v55, 8.507059e+37 }
0x1406   :  { %v1437_v60 = vpop.eup %1436 }
0x1407   :  { %v1196_v61 = vmul.f32 %v1437_v60, %v1194_v49  ;;  %vm1201_vm8 = vweird.f32 %v1437_v60 }
0x1408   :  { %vm1202_vm9 = vmor %vm1200_vm6, %vm1201_vm8 }
0x1409   :  { %v1197_v53 = vsub.f32 1.0, %v1196_v61 }
0x140b   :  { %v1198_v62 = vmul.f32 %v1437_v60, %v1197_v53 }
0x140d   :  { %v1199_v63 = vadd.f32 %v1437_v60, %v1198_v62 }
0x140f   :  { %v1203_v3 = vsel %vm1202_vm9, %v1437_v60, %v1199_v63 }
0x1410   :  { %v1208_v35 = vsel %vm1205_vm7, %v1207_v1, %v1203_v3 }
0x1411   :  { %v1210_v47 = vmul.f32 2.0, %v1208_v35  ;;  %v1212_v9 = vmul.f32 %v1208_v35, %v1080_v42 }
0x1413   :  { %v1332_v4 = vadd.f32 -1.0, %v1210_v47 }
0x1415   :  { %1214 = vrot.lane.b32.xlu0 %v1332_v4, %s1553_s0 }
0x141d   :  { %1230 = vrot.lane.b32.xlu0 %v1229_v7, %s1554_s2 }
0x1487   :  { %v1215_v8 = vpop.permute.xlu0 %1214 }
0x1488   :  { %v1217_v37 = vmul.f32 %v1215_v8, %v1208_v35 }
0x148a   :  { %1219 = vrot.lane.b32.xlu1 %v1217_v37, %s1553_s0 }
0x148f   :  { %v1231_v0 = vpop.permute.xlu0 %1230 }
0x14fc   :  { %v1220_v38 = vpop.permute.xlu1 %1219 }
0x14fd   :  { %v1222_v10 = vadd.f32 %v1220_v38, %v1212_v9 }
0x14ff   :  { %1438 = vtanh.f32 %v1222_v10 }
0x1505   :  { %v1439_v11 = vpop.eup %1438 }
0x1506   :  { %1225 = vrot.lane.b32.xlu2 %v1439_v11, %s1553_s0 }
0x1560   :  { %v1226_v39 = vpop.permute.xlu2 %1225 }
0x1561   :  { %v1228_v2 = vmul.f32 %v1226_v39, %v1208_v35 }
0x1563   :  { %v1233_v5 = vmul.f32 %v1231_v0, %v1228_v2 }
0x1565   :  { %1235 = vrot.lane.b32.xlu1 %v1233_v5, %s1554_s2 }
0x15d7   :  { %v1236_v40 = vpop.permute.xlu1 %1235 }
0x15d8   :  { %v1239_v6 = vsel %vm1238_vm10, %v1236_v40, 0.0 }
0x15d9   :  { %1240 = vadd.xlane.f32.xlu2 %v1239_v6 }
0x164c   :  { %v1241_v12 = vpop.xlane.xlu2 %1240 }
0x164d   :  { %v1244_v44 = vadd.f32 %v1242_v41, %v1241_v12 }
0x164f   :  { %v1333_v13 = vmul.f32 -1.442695, %v1244_v44 }
0x1651   :  { %1440 = vpow2.f32 %v1333_v13 }
0x1657   :  { %v1441_v14 = vpop.eup %1440 }
0x1658   :  { %v1248_v15 = vadd.f32 1.0, %v1441_v14 }
0x165a   :  { %1442 = vrcp.f32 %v1248_v15  ;;  %v1260_v19 = vand.u32 2147483648, %v1248_v15  ;;  %v1258_v21 = vand.u32 2147483647, %v1248_v15  ;;  %vm1254_vm12 = vweird.f32 %v1248_v15 }
0x165c   :  { %v1261_v23 = vor.u32 1.1754944e-38, %v1260_v19  ;;  %vm1259_vm15 = vcmp.eq.f32.partialorder %v1258_v21, 8.507059e+37 }
0x1660   :  { %v1443_v16 = vpop.eup %1442 }
0x1661   :  { %v1250_v17 = vmul.f32 %v1443_v16, %v1248_v15  ;;  %vm1255_vm11 = vweird.f32 %v1443_v16 }
0x1662   :  { %vm1256_vm13 = vmor %vm1254_vm12, %vm1255_vm11 }
0x1663   :  { %v1251_v18 = vsub.f32 1.0, %v1250_v17 }
0x1665   :  { %v1252_v20 = vmul.f32 %v1443_v16, %v1251_v18 }
0x1667   :  { %v1253_v22 = vadd.f32 %v1443_v16, %v1252_v20 }
0x1669   :  { %v1257_v24 = vsel %vm1256_vm13, %v1443_v16, %v1253_v22 }
0x166a   :  { %v1262_v25 = vsel %vm1259_vm15, %v1261_v23, %v1257_v24 }
0x166b   :  { %1265 = vst.msk [vmem:[#allocation8] sm:$0x1] %vm1264_vm14, %v1262_v25 }
0x166c   :  { %1276 = dma.vmem_to_hbm [thread:$0]  %s1272_s30, 16, %s1274_s6, [#allocation4]  }
0x166d   :  { %1545 = dma.done.wait [#allocation4], 16  }
0x166e   :  { %1546 = vsyncadd [#allocation4], 4294967280 }
0x166f   :  { %1281 = vsyncpa [#allocation3], 1 }
0x1670   :  { %1282 = vsyncpa [#allocation6], 1 }
0x1671   :  { %1283 = vsyncpa [#allocation4], 1 }

</bundles_post_ra>
